<compile_context>
chip_gen: v7x
topology: tpu7x:2x2x1
jax: 0.10.0
libtpu: 0.0.40
codegen_flags: <defaults>
</compile_context>

<pallas_src>
import math

import jax
import jax.numpy as jnp
import numpy as np
from jax import lax
from jax.experimental import pallas as pl
from jax.experimental.pallas import tpu as pltpu  # noqa: F401  (TPU backend import)

# ---- small, module-consistent config ----
NUM_ITEMS = 64     # num_items (vocab)
EMBED = 32         # embed_size
NUM_HEADS = 2      # num_heads
HIDDEN = 64        # hidden_dim (feedforward)
SEQ = 8
BATCH = 2
EPS = 1e-5
NEG_INF = -1e30

E = EMBED
HD = HIDDEN
V = NUM_ITEMS
H = NUM_HEADS
DH = E // H
R = SEQ * BATCH
VPAD = ((V + 127) // 128) * 128   # 128
LANES = 128

# ---- packed-slab row offsets (every block starts at lane 0; weight blocks 8-row aligned) ----
EMB_OFF  = 0                    # (V, E)    embedding table
WX0A_OFF = EMB_OFF + V          # (E, 4E)   [SA-Q | SA-K | SA-V | CA-K], heads concat per 32 lanes
WX0B_OFF = WX0A_OFF + E         # (E, E)    CA-V
WOSA_OFF = WX0B_OFF + E         # (E, E)    SA out-proj (wo.T)
WQCA_OFF = WOSA_OFF + E         # (E, E)    CA Q proj
WOCA_OFF = WQCA_OFF + E         # (E, E)    CA out-proj
W1_OFF   = WOCA_OFF + E         # (E, HD)   FFN up
W2_OFF   = W1_OFF + E           # (HD, E)   FFN down
WFC_OFF  = W2_OFF + HD          # (E, VPAD) final projection (zero-padded lanes)
BX0A_OFF = WFC_OFF + E          # (1, 4E)
BX0B_OFF = BX0A_OFF + 1         # (1, E)
BOSA_OFF = BX0B_OFF + 1
BQCA_OFF = BOSA_OFF + 1
BOCA_OFF = BQCA_OFF + 1
B1_OFF   = BOCA_OFF + 1         # (1, HD)
B2_OFF   = B1_OFF + 1
BFC_OFF  = B2_OFF + 1           # (1, VPAD)
G1_OFF   = BFC_OFF + 1
BE1_OFF  = G1_OFF + 1
G2_OFF   = BE1_OFF + 1
BE2_OFF  = G2_OFF + 1
G3_OFF   = BE2_OFF + 1
BE3_OFF  = G3_OFF + 1
SLAB_ROWS = ((BE3_OFF + 1 + 7) // 8) * 8        # 368


# ---------------- Pallas kernel ----------------

def decoder_kernel(ids_ref, slab_ref, out_ref):
    scale = 1.0 / math.sqrt(DH)

    # ---- fused embedding gather: one-hot (R,V) @ table (V,E) on the MXU ----
    ids = ids_ref[...]                                              # (R, 1) int32
    vcol = lax.broadcasted_iota(jnp.int32, (R, V), 1)
    onehot = (vcol == ids).astype(jnp.float32)                      # (R, V)
    x0 = jnp.dot(onehot, slab_ref[EMB_OFF:EMB_OFF + V, 0:E],
                 preferred_element_type=jnp.float32)                # (R, E)

    # ---- block-diagonal additive attention bias, generated in-kernel (row r -> batch r % B) ----
    ri = lax.broadcasted_iota(jnp.int32, (R, R), 0)
    ci = lax.broadcasted_iota(jnp.int32, (R, R), 1)
    if BATCH & (BATCH - 1) == 0:                                    # power-of-two fast path
        same = (ri & (BATCH - 1)) == (ci & (BATCH - 1))
    else:
        same = (ri % BATCH) == (ci % BATCH)
    attn_bias = jnp.where(same, 0.0, NEG_INF).astype(jnp.float32)   # (R, R)

    def layernorm(x, g_off, b_off):
        g = slab_ref[g_off:g_off + 1, 0:E]
        b = slab_ref[b_off:b_off + 1, 0:E]
        mu = jnp.mean(x, axis=-1, keepdims=True)
        xc = x - mu
        var = jnp.mean(xc * xc, axis=-1, keepdims=True)
        return xc * lax.rsqrt(var + EPS) * g + b

    def attend(q, k, v):
        # q, k, v: (R, E) with heads concatenated along lanes (DH lanes per head).
        outs = []
        for h in range(H):                                          # static unroll (H == 2)
            lo, hi = h * DH, (h + 1) * DH
            qh, kh, vh = q[:, lo:hi], k[:, lo:hi], v[:, lo:hi]
            s = lax.dot_general(qh, kh, (((1,), (1,)), ((), ())),
                                preferred_element_type=jnp.float32) * scale
            s = s + attn_bias
            s = s - jnp.max(s, axis=-1, keepdims=True)
            p = jnp.exp(s)
            p = p * pl.reciprocal(jnp.sum(p, axis=-1, keepdims=True), approx=True)
            outs.append(jnp.dot(p, vh, preferred_element_type=jnp.float32))
        # lane concat of the two head outputs -> single fused output projection afterwards
        return jnp.concatenate(outs, axis=-1)                       # (R, E)

    # ---- everything that consumes x0, fused: SA Q/K/V + CA K in one 128-lane matmul, CA V next ----
    pa = (jnp.dot(x0, slab_ref[WX0A_OFF:WX0A_OFF + E, :],
                  preferred_element_type=jnp.float32)
          + slab_ref[BX0A_OFF:BX0A_OFF + 1, :])                     # (R, 4E)
    ca_v = (jnp.dot(x0, slab_ref[WX0B_OFF:WX0B_OFF + E, 0:E],
                    preferred_element_type=jnp.float32)
            + slab_ref[BX0B_OFF:BX0B_OFF + 1, 0:E])                 # (R, E)
    sa_q = pa[:, 0:E]
    sa_k = pa[:, E:2 * E]
    sa_v = pa[:, 2 * E:3 * E]
    ca_k = pa[:, 3 * E:4 * E]

    # ---- self-attention block (post-norm); dropout = identity (eval mode) ----
    sa = attend(sa_q, sa_k, sa_v)
    sa = (jnp.dot(sa, slab_ref[WOSA_OFF:WOSA_OFF + E, 0:E],
                  preferred_element_type=jnp.float32)
          + slab_ref[BOSA_OFF:BOSA_OFF + 1, 0:E])
    x = layernorm(x0 + sa, G1_OFF, BE1_OFF)

    # ---- cross-attention block (memory = raw embeddings; K/V already computed from x0) ----
    ca_q = (jnp.dot(x, slab_ref[WQCA_OFF:WQCA_OFF + E, 0:E],
                    preferred_element_type=jnp.float32)
            + slab_ref[BQCA_OFF:BQCA_OFF + 1, 0:E])
    ca = attend(ca_q, ca_k, ca_v)
    ca = (jnp.dot(ca, slab_ref[WOCA_OFF:WOCA_OFF + E, 0:E],
                  preferred_element_type=jnp.float32)
          + slab_ref[BOCA_OFF:BOCA_OFF + 1, 0:E])
    x = layernorm(x + ca, G2_OFF, BE2_OFF)

    # ---- feed-forward block ----
    hdn = jnp.maximum(
        jnp.dot(x, slab_ref[W1_OFF:W1_OFF + E, 0:HD], preferred_element_type=jnp.float32)
        + slab_ref[B1_OFF:B1_OFF + 1, 0:HD], 0.0)
    x = layernorm(
        x + jnp.dot(hdn, slab_ref[W2_OFF:W2_OFF + HD, 0:E], preferred_element_type=jnp.float32)
        + slab_ref[B2_OFF:B2_OFF + 1, 0:E], G3_OFF, BE3_OFF)

    # ---- lane-dense final projection (num_items zero-padded up to 128 lanes) ----
    out_ref[...] = (jnp.dot(x, slab_ref[WFC_OFF:WFC_OFF + E, :],
                            preferred_element_type=jnp.float32)
                    + slab_ref[BFC_OFF:BFC_OFF + 1, :])


# ---------------- host-side packing (done ONCE, outside the per-call path) ----------------

def pack_params(params):
    """Pack all weights/biases/LN params + embedding table into one (SLAB_ROWS, 128) f32 slab."""
    f32 = lambda a: jnp.asarray(a, jnp.float32)

    slab = jnp.zeros((SLAB_ROWS, LANES), jnp.float32)

    def put(s, off, block):
        block = f32(block)
        if block.ndim == 1:
            block = block.reshape(1, -1)
        r, c = block.shape
        return s.at[off:off + r, 0:c].set(block)

    wqkv_sa, bqkv_sa = f32(params["wqkv_sa"]), f32(params["bqkv_sa"])
    wqkv_ca, bqkv_ca = f32(params["wqkv_ca"]), f32(params["bqkv_ca"])

    # packed in_proj (3E, E): rows [0:E]=Q, [E:2E]=K, [2E:3E]=V;  x @ w.T applies them, so the
    # pre-transposed (E, E) blocks already have heads concatenated along the output lanes.
    wx0a = jnp.concatenate([wqkv_sa[0:E].T, wqkv_sa[E:2 * E].T,
                            wqkv_sa[2 * E:3 * E].T, wqkv_ca[E:2 * E].T], axis=1)   # (E, 4E)
    bx0a = jnp.concatenate([bqkv_sa[0:E], bqkv_sa[E:2 * E],
                            bqkv_sa[2 * E:3 * E], bqkv_ca[E:2 * E]])               # (4E,)

    wfc_pad = jnp.zeros((E, VPAD), jnp.float32).at[:, :V].set(f32(params["wfc"]).T)
    bfc_pad = jnp.zeros((VPAD,), jnp.float32).at[:V].set(f32(params["bfc"]))

    slab = put(slab, EMB_OFF, params["emb"])
    slab = put(slab, WX0A_OFF, wx0a)
    slab = put(slab, WX0B_OFF, wqkv_ca[2 * E:3 * E].T)     # CA V
    slab = put(slab, WOSA_OFF, f32(params["wo_sa"]).T)
    slab = put(slab, WQCA_OFF, wqkv_ca[0:E].T)
    slab = put(slab, WOCA_OFF, f32(params["wo_ca"]).T)
    slab = put(slab, W1_OFF, f32(params["w1"]).T)
    slab = put(slab, W2_OFF, f32(params["w2"]).T)
    slab = put(slab, WFC_OFF, wfc_pad)
    slab = put(slab, BX0A_OFF, bx0a)
    slab = put(slab, BX0B_OFF, bqkv_ca[2 * E:3 * E])
    slab = put(slab, BOSA_OFF, params["bo_sa"])
    slab = put(slab, BQCA_OFF, bqkv_ca[0:E])
    slab = put(slab, BOCA_OFF, params["bo_ca"])
    slab = put(slab, B1_OFF, params["b1"])
    slab = put(slab, B2_OFF, params["b2"])
    slab = put(slab, BFC_OFF, bfc_pad)
    slab = put(slab, G1_OFF, params["g1"])
    slab = put(slab, BE1_OFF, params["be1"])
    slab = put(slab, G2_OFF, params["g2"])
    slab = put(slab, BE2_OFF, params["be2"])
    slab = put(slab, G3_OFF, params["g3"])
    slab = put(slab, BE3_OFF, params["be3"])
    return slab


# ---------------- wrapper: two-operand single pallas_call ----------------

@jax.jit
def transformer_decoder_forward(input_seqs, slab):
    S, B = input_seqs.shape
    assert (S, B) == (SEQ, BATCH)
    # folded row order r = s*B + b (row-major flatten of the (S, B) id matrix)
    ids = input_seqs.reshape(S * B, 1).astype(jnp.int32)

    out = pl.pallas_call(
        decoder_kernel,
        out_shape=jax.ShapeDtypeStruct((S * B, VPAD), jnp.float32),
        # No grid: single invocation; both operands (ids + packed weight slab) are whole-array
        # VMEM blocks -> exactly two input DMAs, no per-step pipeline overhead. Working set
        # (~0.2 MiB) is far below the VMEM limit on v5e/v6e/v7x, so no vmem_limit_bytes needed.
    )(ids, slab)

    # drop lane padding and restore the PyTorch (S, B, num_items) layout — pure reshape.
    return out[:, :V].reshape(S, B, V)


# ---------------- independent pure-JAX reference (PyTorch semantics, eval mode) ----------------

def reference_forward(input_seqs, params):
    Ed = params["emb"].shape[1]
    dh = Ed // NUM_HEADS
    emb = jnp.take(params["emb"], input_seqs, axis=0).astype(jnp.float32)   # (S, B, E)

    def layernorm(x, g, b):
        mu = jnp.mean(x, -1, keepdims=True)
        var = jnp.mean((x - mu) ** 2, -1, keepdims=True)
        return (x - mu) / jnp.sqrt(var + EPS) * g + b

    def mha(q_in, kv_in, wqkv, bqkv, wo, bo):
        q = q_in @ wqkv[:Ed].T + bqkv[:Ed]
        k = kv_in @ wqkv[Ed:2 * Ed].T + bqkv[Ed:2 * Ed]
        v = kv_in @ wqkv[2 * Ed:].T + bqkv[2 * Ed:]
        heads = []
        for h in range(NUM_HEADS):
            qh, kh, vh = (t[:, h * dh:(h + 1) * dh] for t in (q, k, v))
            s = qh @ kh.T / math.sqrt(dh)
            s = s - jnp.max(s, -1, keepdims=True)
            p = jnp.exp(s)
            p = p / jnp.sum(p, -1, keepdims=True)
            heads.append(p @ vh)
        return jnp.concatenate(heads, -1) @ wo.T + bo

    def one_batch(xb):                                           # xb: (S, E)
        x = layernorm(xb + mha(xb, xb, params["wqkv_sa"], params["bqkv_sa"],
                               params["wo_sa"], params["bo_sa"]), params["g1"], params["be1"])
        x = layernorm(x + mha(x, xb, params["wqkv_ca"], params["bqkv_ca"],
                              params["wo_ca"], params["bo_ca"]), params["g2"], params["be2"])
        hdn = jnp.maximum(x @ params["w1"].T + params["b1"], 0.0)
        x = layernorm(x + hdn @ params["w2"].T + params["b2"], params["g3"], params["be3"])
        return x @ params["wfc"].T + params["bfc"]

    return jax.vmap(one_batch, in_axes=1, out_axes=1)(emb)       # (S, B, num_items)


# ---------------- deterministic parameter init ----------------

def init_params(key):
    ks = jax.random.split(key, 16)

    def lin(k, shape, scale):
        return jax.random.normal(k, shape, jnp.float32) * scale

    Ed, Hd, Vd = EMBED, HIDDEN, NUM_ITEMS
    # Snap the embedding table to bf16-representable values so the in-kernel one-hot-matmul
    # gather is bit-exact regardless of the MXU's default (bf16-pass) f32 matmul precision.
    emb = jax.random.normal(ks[0], (Vd, Ed), jnp.float32).astype(jnp.bfloat16).astype(jnp.float32)
    return {
        "emb": emb,
        "wqkv_sa": lin(ks[1], (3 * Ed, Ed), 1.0 / math.sqrt(Ed)),
        "bqkv_sa": jnp.zeros((3 * Ed,), jnp.float32),
        "wo_sa":   lin(ks[2], (Ed, Ed), 1.0 / math.sqrt(Ed)),
        "bo_sa":   jnp.zeros((Ed,), jnp.float32),
        "wqkv_ca": lin(ks[3], (3 * Ed, Ed), 1.0 / math.sqrt(Ed)),
        "bqkv_ca": jnp.zeros((3 * Ed,), jnp.float32),
        "wo_ca":   lin(ks[4], (Ed, Ed), 1.0 / math.sqrt(Ed)),
        "bo_ca":   jnp.zeros((Ed,), jnp.float32),
        "g1": jnp.ones((Ed,), jnp.float32), "be1": jnp.zeros((Ed,), jnp.float32),
        "g2": jnp.ones((Ed,), jnp.float32), "be2": jnp.zeros((Ed,), jnp.float32),
        "g3": jnp.ones((Ed,), jnp.float32), "be3": jnp.zeros((Ed,), jnp.float32),
        "w1": lin(ks[5], (Hd, Ed), 1.0 / math.sqrt(Ed)),
        "b1": lin(ks[6], (Hd,), 0.01),
        "w2": lin(ks[7], (Ed, Hd), 1.0 / math.sqrt(Hd)),
        "b2": lin(ks[8], (Ed,), 0.01),
        "wfc": lin(ks[9], (Vd, Ed), 1.0 / math.sqrt(Ed)),
        "bfc": lin(ks[10], (Vd,), 0.01),
    }


if __name__ == "__main__":
    key = jax.random.PRNGKey(0)
    k_param, k_data = jax.random.split(key)
    params = init_params(k_param)

    # packed weight slab built ONCE (outside the per-call path) and reused for every forward call
    slab = jax.block_until_ready(pack_params(params))

    # input_seqs: (S, B) int32 item ids, PyTorch seq-first layout (batch_first=False)
    input_seqs = jax.random.randint(k_data, (SEQ, BATCH), 0, NUM_ITEMS, dtype=jnp.int32)

    out = jax.block_until_ready(transformer_decoder_forward(input_seqs, slab))
    assert out.shape == (SEQ, BATCH, NUM_ITEMS)

    ref = jax.block_until_ready(reference_forward(input_seqs, params))
    # Tolerance covers the TPU's default bf16-pass matmul precision plus the ~1e-4 relative
    # error of the EUP approx reciprocal used in the kernel's softmax.
    np.testing.assert_allclose(np.asarray(out), np.asarray(ref), atol=5e-3, rtol=5e-3)
    print("KERNEL_OK")
</pallas_src>

<mosaic_0001>
module attributes {stable_mosaic.version = 11 : i64} {
  func.func @decoder_kernel(%arg0: memref<16x1xi32, #tpu.memory_space<vmem>>, %arg1: memref<368x128xf32, #tpu.memory_space<vmem>>, %arg2: memref<16x128xf32, #tpu.memory_space<vmem>>) attributes {dimension_semantics = [], scalar_prefetch = 0 : i64, scratch_operands = 0 : i64, tpu.core_type = #tpu.core_type<tc>} {
    %c0 = arith.constant 0 : index
    %c0_0 = arith.constant 0 : index
    %0 = vector.load %arg0[%c0, %c0_0] : memref<16x1xi32, #tpu.memory_space<vmem>>, vector<16x1xi32>
    %1 = tpu.iota {dimensions = array<i32: 1>} : vector<16x64xi32>
    %2 = vector.broadcast %0 : vector<16x1xi32> to vector<16x64xi32>
    %3 = arith.cmpi eq, %1, %2 : vector<16x64xi32>
    %4 = arith.extui %3 : vector<16x64xi1> to vector<16x64xi32>
    %5 = arith.sitofp %4 : vector<16x64xi32> to vector<16x64xf32>
    %c0_1 = arith.constant 0 : index
    %c0_2 = arith.constant 0 : index
    %6 = vector.load %arg1[%c0_1, %c0_2] : memref<368x128xf32, #tpu.memory_space<vmem>>, vector<64x32xf32>
    %cst = arith.constant dense<0.000000e+00> : vector<16x32xf32>
    %7 = tpu.matmul %5, %6, %cst {dimension_numbers = #tpu.dot_dimension_numbers<[1], [0], [0], [1], [0, 0, 1, 1], [], []>} : vector<16x64xf32>, vector<64x32xf32>, vector<16x32xf32> -> vector<16x32xf32>
    %8 = tpu.iota {dimensions = array<i32: 0>} : vector<16x16xi32>
    %9 = tpu.iota {dimensions = array<i32: 1>} : vector<16x16xi32>
    %c1_i32 = arith.constant 1 : i32
    %10 = vector.broadcast %c1_i32 : i32 to vector<16x16xi32>
    %11 = arith.andi %8, %10 : vector<16x16xi32>
    %c1_i32_3 = arith.constant 1 : i32
    %12 = vector.broadcast %c1_i32_3 : i32 to vector<16x16xi32>
    %13 = arith.andi %9, %12 : vector<16x16xi32>
    %14 = arith.cmpi eq, %11, %13 : vector<16x16xi32>
    %cst_4 = arith.constant 0.000000e+00 : f32
    %cst_5 = arith.constant -1.000000e+30 : f32
    %15 = vector.broadcast %cst_4 : f32 to vector<16x16xf32>
    %16 = vector.broadcast %cst_5 : f32 to vector<16x16xf32>
    %17 = arith.select %14, %15, %16 : vector<16x16xi1>, vector<16x16xf32>
    %c64 = arith.constant 64 : index
    %c0_6 = arith.constant 0 : index
    %18 = vector.load %arg1[%c64, %c0_6] : memref<368x128xf32, #tpu.memory_space<vmem>>, vector<32x128xf32>
    %cst_7 = arith.constant dense<0.000000e+00> : vector<16x128xf32>
    %19 = tpu.matmul %7, %18, %cst_7 {dimension_numbers = #tpu.dot_dimension_numbers<[1], [0], [0], [1], [0, 0, 1, 1], [], []>} : vector<16x32xf32>, vector<32x128xf32>, vector<16x128xf32> -> vector<16x128xf32>
    %c352 = arith.constant 352 : index
    %c0_8 = arith.constant 0 : index
    %20 = vector.load %arg1[%c352, %c0_8] : memref<368x128xf32, #tpu.memory_space<vmem>>, vector<1x128xf32>
    %21 = vector.broadcast %20 : vector<1x128xf32> to vector<16x128xf32>
    %22 = arith.addf %19, %21 : vector<16x128xf32>
    %c96 = arith.constant 96 : index
    %c0_9 = arith.constant 0 : index
    %23 = vector.load %arg1[%c96, %c0_9] : memref<368x128xf32, #tpu.memory_space<vmem>>, vector<32x32xf32>
    %cst_10 = arith.constant dense<0.000000e+00> : vector<16x32xf32>
    %24 = tpu.matmul %7, %23, %cst_10 {dimension_numbers = #tpu.dot_dimension_numbers<[1], [0], [0], [1], [0, 0, 1, 1], [], []>} : vector<16x32xf32>, vector<32x32xf32>, vector<16x32xf32> -> vector<16x32xf32>
    %c353 = arith.constant 353 : index
    %c0_11 = arith.constant 0 : index
    %25 = vector.load %arg1[%c353, %c0_11] : memref<368x128xf32, #tpu.memory_space<vmem>>, vector<1x32xf32>
    %26 = vector.broadcast %25 : vector<1x32xf32> to vector<16x32xf32>
    %27 = arith.addf %24, %26 : vector<16x32xf32>
    %28 = vector.extract_strided_slice %22 {offsets = [0, 0], sizes = [16, 32], strides = [1, 1]} : vector<16x128xf32> to vector<16x32xf32>
    %29 = vector.extract_strided_slice %22 {offsets = [0, 32], sizes = [16, 32], strides = [1, 1]} : vector<16x128xf32> to vector<16x32xf32>
    %30 = vector.extract_strided_slice %22 {offsets = [0, 64], sizes = [16, 32], strides = [1, 1]} : vector<16x128xf32> to vector<16x32xf32>
    %31 = vector.extract_strided_slice %22 {offsets = [0, 96], sizes = [16, 32], strides = [1, 1]} : vector<16x128xf32> to vector<16x32xf32>
    %32 = vector.extract_strided_slice %28 {offsets = [0, 0], sizes = [16, 16], strides = [1, 1]} : vector<16x32xf32> to vector<16x16xf32>
    %33 = vector.extract_strided_slice %29 {offsets = [0, 0], sizes = [16, 16], strides = [1, 1]} : vector<16x32xf32> to vector<16x16xf32>
    %34 = vector.extract_strided_slice %30 {offsets = [0, 0], sizes = [16, 16], strides = [1, 1]} : vector<16x32xf32> to vector<16x16xf32>
    %cst_12 = arith.constant dense<0.000000e+00> : vector<16x16xf32>
    %35 = tpu.matmul %32, %33, %cst_12 {dimension_numbers = #tpu.dot_dimension_numbers<[1], [1], [0], [0], [0, 0, 1, 0], [], []>} : vector<16x16xf32>, vector<16x16xf32>, vector<16x16xf32> -> vector<16x16xf32>
    %cst_13 = arith.constant 2.500000e-01 : f32
    %36 = vector.broadcast %cst_13 : f32 to vector<16x16xf32>
    %37 = arith.mulf %35, %36 : vector<16x16xf32>
    %38 = arith.addf %37, %17 : vector<16x16xf32>
    %cst_14 = arith.constant dense<0xFF800000> : vector<16xf32>
    %39 = vector.multi_reduction <maximumf>, %38, %cst_14 [1] : vector<16x16xf32> to vector<16xf32>
    %40 = vector.shape_cast %39 : vector<16xf32> to vector<16x1xf32>
    %41 = vector.broadcast %40 : vector<16x1xf32> to vector<16x16xf32>
    %42 = arith.subf %38, %41 : vector<16x16xf32>
    %43 = math.exp %42 : vector<16x16xf32>
    %cst_15 = arith.constant dense<0.000000e+00> : vector<16xf32>
    %44 = vector.multi_reduction <add>, %43, %cst_15 [1] : vector<16x16xf32> to vector<16xf32>
    %45 = vector.shape_cast %44 : vector<16xf32> to vector<16x1xf32>
    %46 = tpu.reciprocal %45 {approx = true} : vector<16x1xf32> -> vector<16x1xf32>
    %47 = vector.broadcast %46 : vector<16x1xf32> to vector<16x16xf32>
    %48 = arith.mulf %43, %47 : vector<16x16xf32>
    %cst_16 = arith.constant dense<0.000000e+00> : vector<16x16xf32>
    %49 = tpu.matmul %48, %34, %cst_16 {dimension_numbers = #tpu.dot_dimension_numbers<[1], [0], [0], [1], [0, 0, 1, 1], [], []>} : vector<16x16xf32>, vector<16x16xf32>, vector<16x16xf32> -> vector<16x16xf32>
    %50 = vector.extract_strided_slice %28 {offsets = [0, 16], sizes = [16, 16], strides = [1, 1]} : vector<16x32xf32> to vector<16x16xf32>
    %51 = vector.extract_strided_slice %29 {offsets = [0, 16], sizes = [16, 16], strides = [1, 1]} : vector<16x32xf32> to vector<16x16xf32>
    %52 = vector.extract_strided_slice %30 {offsets = [0, 16], sizes = [16, 16], strides = [1, 1]} : vector<16x32xf32> to vector<16x16xf32>
    %cst_17 = arith.constant dense<0.000000e+00> : vector<16x16xf32>
    %53 = tpu.matmul %50, %51, %cst_17 {dimension_numbers = #tpu.dot_dimension_numbers<[1], [1], [0], [0], [0, 0, 1, 0], [], []>} : vector<16x16xf32>, vector<16x16xf32>, vector<16x16xf32> -> vector<16x16xf32>
    %cst_18 = arith.constant 2.500000e-01 : f32
    %54 = vector.broadcast %cst_18 : f32 to vector<16x16xf32>
    %55 = arith.mulf %53, %54 : vector<16x16xf32>
    %56 = arith.addf %55, %17 : vector<16x16xf32>
    %cst_19 = arith.constant dense<0xFF800000> : vector<16xf32>
    %57 = vector.multi_reduction <maximumf>, %56, %cst_19 [1] : vector<16x16xf32> to vector<16xf32>
    %58 = vector.shape_cast %57 : vector<16xf32> to vector<16x1xf32>
    %59 = vector.broadcast %58 : vector<16x1xf32> to vector<16x16xf32>
    %60 = arith.subf %56, %59 : vector<16x16xf32>
    %61 = math.exp %60 : vector<16x16xf32>
    %cst_20 = arith.constant dense<0.000000e+00> : vector<16xf32>
    %62 = vector.multi_reduction <add>, %61, %cst_20 [1] : vector<16x16xf32> to vector<16xf32>
    %63 = vector.shape_cast %62 : vector<16xf32> to vector<16x1xf32>
    %64 = tpu.reciprocal %63 {approx = true} : vector<16x1xf32> -> vector<16x1xf32>
    %65 = vector.broadcast %64 : vector<16x1xf32> to vector<16x16xf32>
    %66 = arith.mulf %61, %65 : vector<16x16xf32>
    %cst_21 = arith.constant dense<0.000000e+00> : vector<16x16xf32>
    %67 = tpu.matmul %66, %52, %cst_21 {dimension_numbers = #tpu.dot_dimension_numbers<[1], [0], [0], [1], [0, 0, 1, 1], [], []>} : vector<16x16xf32>, vector<16x16xf32>, vector<16x16xf32> -> vector<16x16xf32>
    %68 = tpu.concatenate %49, %67 in 1 : vector<16x16xf32>, vector<16x16xf32> -> vector<16x32xf32>
    %c128 = arith.constant 128 : index
    %c0_22 = arith.constant 0 : index
    %69 = vector.load %arg1[%c128, %c0_22] : memref<368x128xf32, #tpu.memory_space<vmem>>, vector<32x32xf32>
    %cst_23 = arith.constant dense<0.000000e+00> : vector<16x32xf32>
    %70 = tpu.matmul %68, %69, %cst_23 {dimension_numbers = #tpu.dot_dimension_numbers<[1], [0], [0], [1], [0, 0, 1, 1], [], []>} : vector<16x32xf32>, vector<32x32xf32>, vector<16x32xf32> -> vector<16x32xf32>
    %c354 = arith.constant 354 : index
    %c0_24 = arith.constant 0 : index
    %71 = vector.load %arg1[%c354, %c0_24] : memref<368x128xf32, #tpu.memory_space<vmem>>, vector<1x32xf32>
    %72 = vector.broadcast %71 : vector<1x32xf32> to vector<16x32xf32>
    %73 = arith.addf %70, %72 : vector<16x32xf32>
    %74 = arith.addf %7, %73 : vector<16x32xf32>
    %c360 = arith.constant 360 : index
    %c0_25 = arith.constant 0 : index
    %75 = vector.load %arg1[%c360, %c0_25] : memref<368x128xf32, #tpu.memory_space<vmem>>, vector<1x32xf32>
    %c361 = arith.constant 361 : index
    %c0_26 = arith.constant 0 : index
    %76 = vector.load %arg1[%c361, %c0_26] : memref<368x128xf32, #tpu.memory_space<vmem>>, vector<1x32xf32>
    %cst_27 = arith.constant dense<0.000000e+00> : vector<16xf32>
    %77 = vector.multi_reduction <add>, %74, %cst_27 [1] : vector<16x32xf32> to vector<16xf32>
    %78 = vector.shape_cast %77 : vector<16xf32> to vector<16x1xf32>
    %cst_28 = arith.constant 3.200000e+01 : f32
    %79 = vector.broadcast %cst_28 : f32 to vector<16x1xf32>
    %80 = arith.divf %78, %79 : vector<16x1xf32>
    %81 = vector.broadcast %80 : vector<16x1xf32> to vector<16x32xf32>
    %82 = arith.subf %74, %81 : vector<16x32xf32>
    %83 = arith.mulf %82, %82 : vector<16x32xf32>
    %cst_29 = arith.constant dense<0.000000e+00> : vector<16xf32>
    %84 = vector.multi_reduction <add>, %83, %cst_29 [1] : vector<16x32xf32> to vector<16xf32>
    %85 = vector.shape_cast %84 : vector<16xf32> to vector<16x1xf32>
    %cst_30 = arith.constant 3.200000e+01 : f32
    %86 = vector.broadcast %cst_30 : f32 to vector<16x1xf32>
    %87 = arith.divf %85, %86 : vector<16x1xf32>
    %cst_31 = arith.constant 9.99999974E-6 : f32
    %88 = vector.broadcast %cst_31 : f32 to vector<16x1xf32>
    %89 = arith.addf %87, %88 : vector<16x1xf32>
    %90 = math.rsqrt %89 : vector<16x1xf32>
    %91 = vector.broadcast %90 : vector<16x1xf32> to vector<16x32xf32>
    %92 = arith.mulf %82, %91 : vector<16x32xf32>
    %93 = vector.broadcast %75 : vector<1x32xf32> to vector<16x32xf32>
    %94 = arith.mulf %92, %93 : vector<16x32xf32>
    %95 = vector.broadcast %76 : vector<1x32xf32> to vector<16x32xf32>
    %96 = arith.addf %94, %95 : vector<16x32xf32>
    %c160 = arith.constant 160 : index
    %c0_32 = arith.constant 0 : index
    %97 = vector.load %arg1[%c160, %c0_32] : memref<368x128xf32, #tpu.memory_space<vmem>>, vector<32x32xf32>
    %cst_33 = arith.constant dense<0.000000e+00> : vector<16x32xf32>
    %98 = tpu.matmul %96, %97, %cst_33 {dimension_numbers = #tpu.dot_dimension_numbers<[1], [0], [0], [1], [0, 0, 1, 1], [], []>} : vector<16x32xf32>, vector<32x32xf32>, vector<16x32xf32> -> vector<16x32xf32>
    %c355 = arith.constant 355 : index
    %c0_34 = arith.constant 0 : index
    %99 = vector.load %arg1[%c355, %c0_34] : memref<368x128xf32, #tpu.memory_space<vmem>>, vector<1x32xf32>
    %100 = vector.broadcast %99 : vector<1x32xf32> to vector<16x32xf32>
    %101 = arith.addf %98, %100 : vector<16x32xf32>
    %102 = vector.extract_strided_slice %101 {offsets = [0, 0], sizes = [16, 16], strides = [1, 1]} : vector<16x32xf32> to vector<16x16xf32>
    %103 = vector.extract_strided_slice %31 {offsets = [0, 0], sizes = [16, 16], strides = [1, 1]} : vector<16x32xf32> to vector<16x16xf32>
    %104 = vector.extract_strided_slice %27 {offsets = [0, 0], sizes = [16, 16], strides = [1, 1]} : vector<16x32xf32> to vector<16x16xf32>
    %cst_35 = arith.constant dense<0.000000e+00> : vector<16x16xf32>
    %105 = tpu.matmul %102, %103, %cst_35 {dimension_numbers = #tpu.dot_dimension_numbers<[1], [1], [0], [0], [0, 0, 1, 0], [], []>} : vector<16x16xf32>, vector<16x16xf32>, vector<16x16xf32> -> vector<16x16xf32>
    %cst_36 = arith.constant 2.500000e-01 : f32
    %106 = vector.broadcast %cst_36 : f32 to vector<16x16xf32>
    %107 = arith.mulf %105, %106 : vector<16x16xf32>
    %108 = arith.addf %107, %17 : vector<16x16xf32>
    %cst_37 = arith.constant dense<0xFF800000> : vector<16xf32>
    %109 = vector.multi_reduction <maximumf>, %108, %cst_37 [1] : vector<16x16xf32> to vector<16xf32>
    %110 = vector.shape_cast %109 : vector<16xf32> to vector<16x1xf32>
    %111 = vector.broadcast %110 : vector<16x1xf32> to vector<16x16xf32>
    %112 = arith.subf %108, %111 : vector<16x16xf32>
    %113 = math.exp %112 : vector<16x16xf32>
    %cst_38 = arith.constant dense<0.000000e+00> : vector<16xf32>
    %114 = vector.multi_reduction <add>, %113, %cst_38 [1] : vector<16x16xf32> to vector<16xf32>
    %115 = vector.shape_cast %114 : vector<16xf32> to vector<16x1xf32>
    %116 = tpu.reciprocal %115 {approx = true} : vector<16x1xf32> -> vector<16x1xf32>
    %117 = vector.broadcast %116 : vector<16x1xf32> to vector<16x16xf32>
    %118 = arith.mulf %113, %117 : vector<16x16xf32>
    %cst_39 = arith.constant dense<0.000000e+00> : vector<16x16xf32>
    %119 = tpu.matmul %118, %104, %cst_39 {dimension_numbers = #tpu.dot_dimension_numbers<[1], [0], [0], [1], [0, 0, 1, 1], [], []>} : vector<16x16xf32>, vector<16x16xf32>, vector<16x16xf32> -> vector<16x16xf32>
    %120 = vector.extract_strided_slice %101 {offsets = [0, 16], sizes = [16, 16], strides = [1, 1]} : vector<16x32xf32> to vector<16x16xf32>
    %121 = vector.extract_strided_slice %31 {offsets = [0, 16], sizes = [16, 16], strides = [1, 1]} : vector<16x32xf32> to vector<16x16xf32>
    %122 = vector.extract_strided_slice %27 {offsets = [0, 16], sizes = [16, 16], strides = [1, 1]} : vector<16x32xf32> to vector<16x16xf32>
    %cst_40 = arith.constant dense<0.000000e+00> : vector<16x16xf32>
    %123 = tpu.matmul %120, %121, %cst_40 {dimension_numbers = #tpu.dot_dimension_numbers<[1], [1], [0], [0], [0, 0, 1, 0], [], []>} : vector<16x16xf32>, vector<16x16xf32>, vector<16x16xf32> -> vector<16x16xf32>
    %cst_41 = arith.constant 2.500000e-01 : f32
    %124 = vector.broadcast %cst_41 : f32 to vector<16x16xf32>
    %125 = arith.mulf %123, %124 : vector<16x16xf32>
    %126 = arith.addf %125, %17 : vector<16x16xf32>
    %cst_42 = arith.constant dense<0xFF800000> : vector<16xf32>
    %127 = vector.multi_reduction <maximumf>, %126, %cst_42 [1] : vector<16x16xf32> to vector<16xf32>
    %128 = vector.shape_cast %127 : vector<16xf32> to vector<16x1xf32>
    %129 = vector.broadcast %128 : vector<16x1xf32> to vector<16x16xf32>
    %130 = arith.subf %126, %129 : vector<16x16xf32>
    %131 = math.exp %130 : vector<16x16xf32>
    %cst_43 = arith.constant dense<0.000000e+00> : vector<16xf32>
    %132 = vector.multi_reduction <add>, %131, %cst_43 [1] : vector<16x16xf32> to vector<16xf32>
    %133 = vector.shape_cast %132 : vector<16xf32> to vector<16x1xf32>
    %134 = tpu.reciprocal %133 {approx = true} : vector<16x1xf32> -> vector<16x1xf32>
    %135 = vector.broadcast %134 : vector<16x1xf32> to vector<16x16xf32>
    %136 = arith.mulf %131, %135 : vector<16x16xf32>
    %cst_44 = arith.constant dense<0.000000e+00> : vector<16x16xf32>
    %137 = tpu.matmul %136, %122, %cst_44 {dimension_numbers = #tpu.dot_dimension_numbers<[1], [0], [0], [1], [0, 0, 1, 1], [], []>} : vector<16x16xf32>, vector<16x16xf32>, vector<16x16xf32> -> vector<16x16xf32>
    %138 = tpu.concatenate %119, %137 in 1 : vector<16x16xf32>, vector<16x16xf32> -> vector<16x32xf32>
    %c192 = arith.constant 192 : index
    %c0_45 = arith.constant 0 : index
    %139 = vector.load %arg1[%c192, %c0_45] : memref<368x128xf32, #tpu.memory_space<vmem>>, vector<32x32xf32>
    %cst_46 = arith.constant dense<0.000000e+00> : vector<16x32xf32>
    %140 = tpu.matmul %138, %139, %cst_46 {dimension_numbers = #tpu.dot_dimension_numbers<[1], [0], [0], [1], [0, 0, 1, 1], [], []>} : vector<16x32xf32>, vector<32x32xf32>, vector<16x32xf32> -> vector<16x32xf32>
    %c356 = arith.constant 356 : index
    %c0_47 = arith.constant 0 : index
    %141 = vector.load %arg1[%c356, %c0_47] : memref<368x128xf32, #tpu.memory_space<vmem>>, vector<1x32xf32>
    %142 = vector.broadcast %141 : vector<1x32xf32> to vector<16x32xf32>
    %143 = arith.addf %140, %142 : vector<16x32xf32>
    %144 = arith.addf %96, %143 : vector<16x32xf32>
    %c362 = arith.constant 362 : index
    %c0_48 = arith.constant 0 : index
    %145 = vector.load %arg1[%c362, %c0_48] : memref<368x128xf32, #tpu.memory_space<vmem>>, vector<1x32xf32>
    %c363 = arith.constant 363 : index
    %c0_49 = arith.constant 0 : index
    %146 = vector.load %arg1[%c363, %c0_49] : memref<368x128xf32, #tpu.memory_space<vmem>>, vector<1x32xf32>
    %cst_50 = arith.constant dense<0.000000e+00> : vector<16xf32>
    %147 = vector.multi_reduction <add>, %144, %cst_50 [1] : vector<16x32xf32> to vector<16xf32>
    %148 = vector.shape_cast %147 : vector<16xf32> to vector<16x1xf32>
    %cst_51 = arith.constant 3.200000e+01 : f32
    %149 = vector.broadcast %cst_51 : f32 to vector<16x1xf32>
    %150 = arith.divf %148, %149 : vector<16x1xf32>
    %151 = vector.broadcast %150 : vector<16x1xf32> to vector<16x32xf32>
    %152 = arith.subf %144, %151 : vector<16x32xf32>
    %153 = arith.mulf %152, %152 : vector<16x32xf32>
    %cst_52 = arith.constant dense<0.000000e+00> : vector<16xf32>
    %154 = vector.multi_reduction <add>, %153, %cst_52 [1] : vector<16x32xf32> to vector<16xf32>
    %155 = vector.shape_cast %154 : vector<16xf32> to vector<16x1xf32>
    %cst_53 = arith.constant 3.200000e+01 : f32
    %156 = vector.broadcast %cst_53 : f32 to vector<16x1xf32>
    %157 = arith.divf %155, %156 : vector<16x1xf32>
    %cst_54 = arith.constant 9.99999974E-6 : f32
    %158 = vector.broadcast %cst_54 : f32 to vector<16x1xf32>
    %159 = arith.addf %157, %158 : vector<16x1xf32>
    %160 = math.rsqrt %159 : vector<16x1xf32>
    %161 = vector.broadcast %160 : vector<16x1xf32> to vector<16x32xf32>
    %162 = arith.mulf %152, %161 : vector<16x32xf32>
    %163 = vector.broadcast %145 : vector<1x32xf32> to vector<16x32xf32>
    %164 = arith.mulf %162, %163 : vector<16x32xf32>
    %165 = vector.broadcast %146 : vector<1x32xf32> to vector<16x32xf32>
    %166 = arith.addf %164, %165 : vector<16x32xf32>
    %c224 = arith.constant 224 : index
    %c0_55 = arith.constant 0 : index
    %167 = vector.load %arg1[%c224, %c0_55] : memref<368x128xf32, #tpu.memory_space<vmem>>, vector<32x64xf32>
    %cst_56 = arith.constant dense<0.000000e+00> : vector<16x64xf32>
    %168 = tpu.matmul %166, %167, %cst_56 {dimension_numbers = #tpu.dot_dimension_numbers<[1], [0], [0], [1], [0, 0, 1, 1], [], []>} : vector<16x32xf32>, vector<32x64xf32>, vector<16x64xf32> -> vector<16x64xf32>
    %c357 = arith.constant 357 : index
    %c0_57 = arith.constant 0 : index
    %169 = vector.load %arg1[%c357, %c0_57] : memref<368x128xf32, #tpu.memory_space<vmem>>, vector<1x64xf32>
    %170 = vector.broadcast %169 : vector<1x64xf32> to vector<16x64xf32>
    %171 = arith.addf %168, %170 : vector<16x64xf32>
    %cst_58 = arith.constant 0.000000e+00 : f32
    %172 = vector.broadcast %cst_58 : f32 to vector<16x64xf32>
    %173 = arith.maximumf %171, %172 : vector<16x64xf32>
    %c256 = arith.constant 256 : index
    %c0_59 = arith.constant 0 : index
    %174 = vector.load %arg1[%c256, %c0_59] : memref<368x128xf32, #tpu.memory_space<vmem>>, vector<64x32xf32>
    %cst_60 = arith.constant dense<0.000000e+00> : vector<16x32xf32>
    %175 = tpu.matmul %173, %174, %cst_60 {dimension_numbers = #tpu.dot_dimension_numbers<[1], [0], [0], [1], [0, 0, 1, 1], [], []>} : vector<16x64xf32>, vector<64x32xf32>, vector<16x32xf32> -> vector<16x32xf32>
    %176 = arith.addf %166, %175 : vector<16x32xf32>
    %c358 = arith.constant 358 : index
    %c0_61 = arith.constant 0 : index
    %177 = vector.load %arg1[%c358, %c0_61] : memref<368x128xf32, #tpu.memory_space<vmem>>, vector<1x32xf32>
    %178 = vector.broadcast %177 : vector<1x32xf32> to vector<16x32xf32>
    %179 = arith.addf %176, %178 : vector<16x32xf32>
    %c364 = arith.constant 364 : index
    %c0_62 = arith.constant 0 : index
    %180 = vector.load %arg1[%c364, %c0_62] : memref<368x128xf32, #tpu.memory_space<vmem>>, vector<1x32xf32>
    %c365 = arith.constant 365 : index
    %c0_63 = arith.constant 0 : index
    %181 = vector.load %arg1[%c365, %c0_63] : memref<368x128xf32, #tpu.memory_space<vmem>>, vector<1x32xf32>
    %cst_64 = arith.constant dense<0.000000e+00> : vector<16xf32>
    %182 = vector.multi_reduction <add>, %179, %cst_64 [1] : vector<16x32xf32> to vector<16xf32>
    %183 = vector.shape_cast %182 : vector<16xf32> to vector<16x1xf32>
    %cst_65 = arith.constant 3.200000e+01 : f32
    %184 = vector.broadcast %cst_65 : f32 to vector<16x1xf32>
    %185 = arith.divf %183, %184 : vector<16x1xf32>
    %186 = vector.broadcast %185 : vector<16x1xf32> to vector<16x32xf32>
    %187 = arith.subf %179, %186 : vector<16x32xf32>
    %188 = arith.mulf %187, %187 : vector<16x32xf32>
    %cst_66 = arith.constant dense<0.000000e+00> : vector<16xf32>
    %189 = vector.multi_reduction <add>, %188, %cst_66 [1] : vector<16x32xf32> to vector<16xf32>
    %190 = vector.shape_cast %189 : vector<16xf32> to vector<16x1xf32>
    %cst_67 = arith.constant 3.200000e+01 : f32
    %191 = vector.broadcast %cst_67 : f32 to vector<16x1xf32>
    %192 = arith.divf %190, %191 : vector<16x1xf32>
    %cst_68 = arith.constant 9.99999974E-6 : f32
    %193 = vector.broadcast %cst_68 : f32 to vector<16x1xf32>
    %194 = arith.addf %192, %193 : vector<16x1xf32>
    %195 = math.rsqrt %194 : vector<16x1xf32>
    %196 = vector.broadcast %195 : vector<16x1xf32> to vector<16x32xf32>
    %197 = arith.mulf %187, %196 : vector<16x32xf32>
    %198 = vector.broadcast %180 : vector<1x32xf32> to vector<16x32xf32>
    %199 = arith.mulf %197, %198 : vector<16x32xf32>
    %200 = vector.broadcast %181 : vector<1x32xf32> to vector<16x32xf32>
    %201 = arith.addf %199, %200 : vector<16x32xf32>
    %c320 = arith.constant 320 : index
    %c0_69 = arith.constant 0 : index
    %202 = vector.load %arg1[%c320, %c0_69] : memref<368x128xf32, #tpu.memory_space<vmem>>, vector<32x128xf32>
    %cst_70 = arith.constant dense<0.000000e+00> : vector<16x128xf32>
    %203 = tpu.matmul %201, %202, %cst_70 {dimension_numbers = #tpu.dot_dimension_numbers<[1], [0], [0], [1], [0, 0, 1, 1], [], []>} : vector<16x32xf32>, vector<32x128xf32>, vector<16x128xf32> -> vector<16x128xf32>
    %c359 = arith.constant 359 : index
    %c0_71 = arith.constant 0 : index
    %204 = vector.load %arg1[%c359, %c0_71] : memref<368x128xf32, #tpu.memory_space<vmem>>, vector<1x128xf32>
    %205 = vector.broadcast %204 : vector<1x128xf32> to vector<16x128xf32>
    %206 = arith.addf %203, %205 : vector<16x128xf32>
    %c0_72 = arith.constant 0 : index
    %c0_73 = arith.constant 0 : index
    %207 = vector.load %arg2[%c0_72, %c0_73] : memref<16x128xf32, #tpu.memory_space<vmem>>, vector<16x128xf32>
    tpu.vector_store %arg2[%c0_72, %c0_73], %206 {strides = array<i32>} : memref<16x128xf32, #tpu.memory_space<vmem>>, vector<16x128xf32>,
    return
  }
}

</mosaic_0001>

<bundles_post_ra>
// kernel: transformer_decoder_forward.1
= control target key start
LH: loop header
LB: loop body
LE: loop exit
PB: predicated region body
PF: predicated region fallthrough
CT: control target
= control target key end

     0   :  { %7 = vsyncpa [#allocation3], 0  ;;  %s2655_s0 = inlined_call_operand.vmem [shape: s32[16,1], index: 0, kind: input, shape index: {}]   ;;  %s2656_s1 = inlined_call_operand.hbm [shape: f32[368,128], index: 1, kind: input, shape index: {}]   ;;  %s2657_s2 = inlined_call_operand.hbm [shape: f32[16,128], index: 2, kind: output, shape index: {}]  }
   0x1   :  { %8 = vsyncpa [#allocation4], 0  ;;  %s2433_s9 = smov [#allocation2]   ;;  %s2385_s13 = scalar_lea.hbm %s2656_s1, 5888 }
   0x2   :  { %s16_s10 = sshll.u32 %s2433_s9, 4  ;;  %p2386_p0 = scmp.ne.s32.totalorder %s2656_s1, %s2385_s13  ;;  %s17_s10 = int_to_ptr.vmem [resolvable:$true] %s16_s10 }
   0x3   :  { %p2389_p1 = scmp.lt.u32.totalorder %s2385_s13, %s2656_s1 }
   0x5   :  { %p2391_p2 = pnand %p2389_p1, %p2386_p0 }
   0x7   :  { %2394 = shalt.err (!%p2391_p2)
}
   0x8   :  { %s2395_s18 = scalar_lea.vmem %s17_s10, 5888  ;;  %p2400_p4 = scmp.lt.s32.totalorder %s17_s10, %s17_s10 }
   0x9   :  { %p2396_p3 = scmp.ne.s32.totalorder %s17_s10, %s2395_s18  ;;  %p2401_p5 = scmp.lt.s32.totalorder %s2395_s18, %s2395_s18 }
   0xb   :  { %p2402_p6 = por %p2401_p5, %p2400_p4 }
   0xd   :  { %p2403_p7 = pnand %p2402_p6, %p2396_p3 }
   0xf   :  { %2406 = shalt.err (!%p2403_p7)
}
  0x10   :  { %s2434_s19 = smov 128   ;;  %s2435_s20 = smov 8  }
  0x11   :  { %22 = dma.hbm_to_vmem [thread:$0]  %s2656_s1, 5888, %s17_s10, [#allocation3], %s2434_s19, %s2434_s19, %s2435_s20  }
  0x12   :  { %2429 = dma.done.wait [#allocation3], 5888  }
  0x13   :  { %2430 = vsyncadd [#allocation3], 4294961408  ;;  %v2436_v0 = vmov 0   ;;  %v26_v1 = vld [vmem:[%s2655_s0] sm:$0xff]  ;;  %v43_v3 = vld [vmem:[#allocation2 + $0x8] sm:$0xff]  ;;  %v28_v21 = vlaneseq  ;;  %vm50_vm0 = vcmask 523264  }
  0x14   :  { %2305 = vset.pattern.permute.xlu0 %v2436_v0  ;;  %v42_v2 = vld [vmem:[#allocation2] sm:$0xff]  ;;  %v44_v4 = vld [vmem:[#allocation2 + $0x10] sm:$0xff]  ;;  %v45_v5 = vld [vmem:[#allocation2 + $0x18] sm:$0xff]  ;;  %v2437_v24 = vmov 0.0   ;;  %vm151_vm3 = vcmask 261120   ;;  %vm323_vm4 = vcmask 130048  }
  0x15   :  { %31 = vperm.xlu0 %2305, %v26_v1   ;;  %v27_v6 = vld [vmem:[%s2655_s0 + $0x8] sm:$0xff]  ;;  %v2163_v7 = vpack.c.bf16 %v43_v3, %v42_v2  ;;  %v2167_v8 = vpack.c.bf16 %v45_v5, %v44_v4  ;;  %v46_v9 = vld [vmem:[#allocation2 + $0x20] sm:$0xff]  ;;  %v48_v12 = vld [vmem:[#allocation2 + $0x30] sm:$0xff]  ;;  %v29_v22 = vand.u32 127, %v28_v21  ;;  %s2438_s0 = smov 96   ;;  %v133_v54 = vshrl.u32 %v28_v21, 7 }
  0x16   :  { %v47_v10 = vld [vmem:[#allocation2 + $0x28] sm:$0xff]  ;;  %v49_v13 = vld [vmem:[#allocation2 + $0x38] sm:$0xff]  ;;  %v142_v14 = vld [vmem:[#allocation2 + $0x40] sm:$0xff]  ;;  %v2439_v60 = vmov -1e+30   ;;  %s2440_s1 = smov 80  }
  0x17   :  { %2164 = vmatprep.subr.bf16.mxu0 %v2163_v7  ;;  %v2171_v11 = vpack.c.bf16 %v47_v10, %v46_v9  ;;  %v143_v15 = vld [vmem:[#allocation2 + $0x48] sm:$0xff]  ;;  %v144_v16 = vld [vmem:[#allocation2 + $0x50] sm:$0xff]  ;;  %v145_v18 = vld [vmem:[#allocation2 + $0x58] sm:$0xff]  ;;  %v2175_v20 = vpack.c.bf16 %v49_v13, %v48_v12  ;;  %v134_v55 = vadd.s32 8, %v133_v54  ;;  %v137_v57 = vand.u32 1, %v29_v22  ;;  %s2441_s27 = smov 112  }
  0x18   :  { %2166 = vmatpush3.bf16.msra.mxu0 %v2163_v7  ;;  %v2179_v17 = vpack.c.bf16 %v143_v15, %v142_v14  ;;  %v2183_v19 = vpack.c.bf16 %v145_v18, %v144_v16  ;;  %v233_v28 = vld [vmem:[#allocation2 + $0x60] sm:$0xff]  ;;  %v234_v29 = vld [vmem:[#allocation2 + $0x68] sm:$0xff]  ;;  %v235_v31 = vld [vmem:[#allocation2 + $0x70] sm:$0xff]  ;;  %v135_v58 = vand.u32 1, %v133_v54  ;;  %s2442_s28 = smov 64   ;;  %s2443_s29 = smov 48  }
  0x19   :  { %34 = vperm.xlu0 %2305, %v27_v6   ;;  %2168 = vmatprep.subr.bf16.mxu0 %v2167_v8  ;;  %v2187_v30 = vpack.c.bf16 %v234_v29, %v233_v28  ;;  %v236_v32 = vld [vmem:[#allocation2 + $0x78] sm:$0xff]  ;;  %v1844_v36 = vld [vmem:[#allocation2 + $0x160] ss:$0 sm:$0xff]  ;;  %v1847_v42 = vld [vmem:[#allocation2 + $0x161] ss:$0 sm:$0xff]  ;;  %v136_v56 = vand.u32 1, %v134_v55 }
  0x1a   :  { %2180 = vmatprep.subr.bf16.mxu1 %v2179_v17  ;;  %v2191_v35 = vpack.c.bf16 %v236_v32, %v235_v31  ;;  %vm2513_vm5 = vmpackc.low %vm323_vm4, %vm323_vm4  ;;  %vm138_vm7 = vcmp.eq.s32.totalorder %v135_v58, %v137_v57  ;;  %s2444_s30 = smov 16   ;;  %s2445_s3 = smov 32  }
  0x1b   :  { %2182 = vmatpush3.bf16.msra.mxu1 %v2179_v17  ;;  %vm139_vm6 = vcmp.eq.s32.totalorder %v136_v56, %v137_v57  ;;  %v2524_v0 = vsel %vm138_vm7, 0.0, %v2439_v60  ;;  %s2446_s4 = smov [#allocation5]  }
  0x1c   :  { %2170 = vmatpush3.bf16.msra.mxu0 %v2167_v8  ;;  %2184 = vmatprep.subr.bf16.mxu1 %v2183_v19  ;;  %v2522_v61 = vsel %vm139_vm6, 0.0, %v2439_v60  ;;  %s1828_s5 = sshll.u32 %s2446_s4, 4  ;;  %s1829_s5 = int_to_ptr.vmem [resolvable:$true] %s1828_s5 }
  0x1d   :  { %2172 = vmatprep.subr.bf16.mxu0 %v2171_v11  ;;  %s2407_s6 = scalar_lea.vmem %s1829_s5, 256  ;;  %p2412_p9 = scmp.lt.s32.totalorder %s1829_s5, %s1829_s5 }
  0x1e   :  { %p2408_p8 = scmp.ne.s32.totalorder %s1829_s5, %s2407_s6  ;;  %p2413_p10 = scmp.lt.s32.totalorder %s2407_s6, %s2407_s6 }
  0x1f   :  { %2186 = vmatpush3.bf16.msra.mxu1 %v2183_v19 }
  0x20   :  { %2174 = vmatpush3.bf16.msra.mxu0 %v2171_v11  ;;  %2188 = vmatprep.subr.bf16.mxu1 %v2187_v30  ;;  %p2414_p11 = por %p2413_p10, %p2412_p9 }
  0x21   :  { %2176 = vmatprep.subr.bf16.mxu0 %v2175_v20 }
  0x22   :  { %p2415_p12 = pnand %p2414_p11, %p2408_p8 }
  0x24   :  { %2178 = vmatpush3.bf16.msra.mxu0 %v2175_v20 }
  0x94   :  { %v32_v23 = vpop.permute.xlu0 %31 }
  0x95   :  { %vm36_vm1 = vcmp.eq.s32.totalorder %v29_v22, %v32_v23 }
  0x96   :  { %v1840_v25 = vsel %vm36_vm1, 1.0, %v2437_v24 }
  0x97   :  { %2008 = vmatprep.mubr.msk.f32.mxu0 %vm50_vm0, %v1840_v25 }
  0x98   :  { %v35_v26 = vpop.permute.xlu0 %34 }
  0x99   :  { %vm37_vm2 = vcmp.eq.s32.totalorder %v29_v22, %v35_v26 }
  0x9a   :  { %v1841_v27 = vsel %vm37_vm2, 1.0, %v2437_v24 }
  0x9b   :  { %2009 = vmatmul.mubr.msk.f32.vlgmr.msra.gmra.mrb[0].mxu0 %vm50_vm0, %v1841_v27 }
 0x16e   :  { %v2485_v33 = vpop.f32.mrb[0].mxu0 }
 0x16f   :  { %v2487_v34 = vpop.f32.mrb[1].mxu0 }
 0x170   :  { %2019 = vmatprep.mubr.msk.f32.mxu1 %vm151_vm3, %v2487_v34 }
 0x171   :  { %2020 = vmatmul.mubr.msk.f32.vlgmr.msra.gmra.mrb[0].mxu1 %vm151_vm3, %v2485_v33 }
 0x172   :  { %2190 = vmatpush3.bf16.msra.mxu1 %v2187_v30  ;;  %2030 = vmatprep.mubr.msk.f32.mxu1 %vm151_vm3, %v2487_v34 }
 0x173   :  { %2192 = vmatprep.subr.bf16.mxu1 %v2191_v35 }
 0x176   :  { %2194 = vmatpush3.bf16.msra.mxu1 %v2191_v35 }
 0x179   :  { %2031 = vmatmul.mubr.msk.f32.vlgmr.msra.gmra.mrb[2].mxu1 %vm151_vm3, %v2485_v33 }
 0x244   :  { %v2021_v37 = vpop.f32.mrb[0].mxu1 }
 0x245   :  { %v230_v38 = vadd.f32 %v2021_v37, %v1844_v36  ;;  %v224_v39 = vpop.f32.mrb[1].mxu1 }
 0x246   :  { %v225_v40 = vadd.f32 %v1844_v36, %v224_v39 }
 0x248   :  { %2037 = vmatprep.mubr.msk.f32.mxu0 %vm323_vm4, %v225_v40  ;;  %v2498_v41 = vpack.i.bf16 %v230_v38, %v225_v40 }
 0x24a   :  { %2307 = vrot.lane.b32.xlu1 %v2498_v41, %s2438_s0 }
 0x24c   :  { %v2032_v43 = vpop.f32.mrb[2].mxu1 }
 0x24d   :  { %v2501_v44 = vadd.f32 %v2032_v43, %v1847_v42  ;;  %v308_v45 = vpop.f32.mrb[3].mxu1 }
 0x24e   :  { %v2503_v46 = vadd.f32 %v1847_v42, %v308_v45 }
 0x250   :  { %v2336_v47 = vpack.i.bf16 %v2501_v44, %v2503_v46  ;;  %v2509_v48 = vpack.c.bf16 %v2501_v44, %v2503_v46  ;;  %v1369_v44 = vld [vmem:[#allocation2 + $0xc0] sm:$0xff]  ;;  %v1370_v46 = vld [vmem:[#allocation2 + $0xc8] sm:$0xff] }
 0x2bc   :  { %v2308_v49 = vpop.permute.xlu1 %2307 }
 0x2bd   :  { %v2310_v50 = vunpack.i.h.bf16 %v2308_v49  ;;  %v2309_v51 = vunpack.i.l.bf16 %v2308_v49 }
 0x2bf   :  { %v2195_v53 = vpack.c.bf16 %v2310_v50, %v2309_v51 }
 0x2c1   :  { %2197 = vmatprep.subr.msk.bf16.mxu0 %vm2513_vm5, %v2195_v53 }
 0x2c2   :  { %2200 = vmatpush3.bf16.xpose.msk.msra.mxu0 %vm2513_vm5, %v2195_v53 }
 0x2c9   :  { %2038 = vmatmul.mubr.msk.f32.vlgmr.msra.gmra.mrb[2].mxu0 %vm323_vm4, %v230_v38 }
 0x39c   :  { %v2039_v59 = vpop.f32.mrb[2].mxu0 }
 0x39d   :  { %v408_v62 = vmul.f32 0.25, %v2039_v59  ;;  %v398_v63 = vpop.f32.mrb[3].mxu0 }
 0x39e   :  { %v407_v1 = vmul.f32 0.25, %v398_v63 }
 0x39f   :  { %v410_v2 = vadd.f32 %v408_v62, %v2522_v61 }
 0x3a0   :  { %v409_v3 = vadd.f32 %v407_v1, %v2524_v0  ;;  %v867_v1 = vld [vmem:[#allocation2 + $0xa0] sm:$0xff] }
 0x3a1   :  { %v414_v4 = vsel %vm323_vm4, %v410_v2, -inf }
 0x3a2   :  { %415 = vmax.xlane.f32.xlu0 %v414_v4  ;;  %v411_v5 = vsel %vm323_vm4, %v409_v3, -inf }
 0x3a3   :  { %412 = vmax.xlane.f32.xlu1 %v411_v5 }
 0x42f   :  { %v416_v6 = vpop.xlane.xlu0 %415 }
 0x430   :  { %v418_v7 = vsub.f32 %v410_v2, %v416_v6  ;;  %v413_v8 = vpop.xlane.xlu1 %412  ;;  %v868_v2 = vld [vmem:[#allocation2 + $0xa8] sm:$0xff] }
 0x431   :  { %v417_v9 = vsub.f32 %v409_v3, %v413_v8  ;;  %v2223_v6 = vpack.c.bf16 %v868_v2, %v867_v1  ;;  %v869_v8 = vld [vmem:[#allocation2 + $0xb0] sm:$0xff]  ;;  %v1866_v1 = vld [vmem:[#allocation2 + $0x169] ss:$0 sm:$0xff] }
 0x432   :  { %v421_v10 = vmul.f32 1.442695, %v418_v7 }
 0x433   :  { %v419_v11 = vmul.f32 1.442695, %v417_v9  ;;  %v870_v9 = vld [vmem:[#allocation2 + $0xb8] sm:$0xff] }
 0x434   :  { %2341 = vpow2.f32 %v421_v10 }
 0x435   :  { %2343 = vpow2.f32 %v419_v11 }
 0x43e   :  { %v2342_v12 = vpop.eup %2341 }
 0x43f   :  { %v2344_v13 = vpop.eup %2343  ;;  %v426_v14 = vsel %vm323_vm4, %v2342_v12, 0.0 }
 0x440   :  { %427 = vadd.xlane.f32.xlu1 %v426_v14  ;;  %v423_v15 = vsel %vm323_vm4, %v2344_v13, 0.0  ;;  %v734_v14 = vld [vmem:[#allocation2 + $0x80] sm:$0xff] }
 0x441   :  { %424 = vadd.xlane.f32.xlu0 %v423_v15  ;;  %v735_v15 = vld [vmem:[#allocation2 + $0x88] sm:$0xff] }
 0x451   :  { %2317 = vrot.lane.b32.xlu1 %v2498_v41, %s2440_s1 }
 0x455   :  { %520 = vrot.lane.b32.xlu1 %v225_v40, %s2441_s27 }
 0x457   :  { %2312 = vrot.lane.b32.xlu0 %v2498_v41, %s2442_s28 }
 0x45b   :  { %522 = vrot.lane.b32.xlu0 %v230_v38, %s2441_s27 }
 0x4cd   :  { %v428_v16 = vpop.xlane.xlu1 %427 }
 0x4ce   :  { %2345 = vrcp.f32 %v428_v16  ;;  %v425_v17 = vpop.xlane.xlu0 %424  ;;  %v2215_v16 = vpack.c.bf16 %v735_v15, %v734_v14 }
 0x4cf   :  { %2347 = vrcp.f32 %v425_v17  ;;  %v736_v17 = vld [vmem:[#allocation2 + $0x90] sm:$0xff] }
 0x4d0   :  { %2216 = vmatprep.subr.bf16.mxu0 %v2215_v16 }
 0x4d1   :  { %v2318_v18 = vpop.permute.xlu1 %2317  ;;  %2218 = vmatpush3.bf16.msra.mxu0 %v2215_v16 }
 0x4d2   :  { %v2313_v19 = vpop.permute.xlu0 %2312  ;;  %v2320_v20 = vunpack.i.h.bf16 %v2318_v18  ;;  %v2319_v21 = vunpack.i.l.bf16 %v2318_v18  ;;  %v737_v18 = vld [vmem:[#allocation2 + $0x98] sm:$0xff] }
 0x4d3   :  { %v2315_v22 = vunpack.i.h.bf16 %v2313_v19  ;;  %v2314_v23 = vunpack.i.l.bf16 %v2313_v19  ;;  %v2219_v19 = vpack.c.bf16 %v737_v18, %v736_v17 }
 0x4d4   :  { %v2205_v25 = vpack.c.bf16 %v2320_v20, %v2319_v21 }
 0x4d5   :  { %v2201_v24 = vpack.c.bf16 %v2315_v22, %v2314_v23  ;;  %v521_v30 = vpop.permute.xlu1 %520  ;;  %2220 = vmatprep.subr.bf16.mxu0 %v2219_v19 }
 0x4d6   :  { %v523_v31 = vpop.permute.xlu0 %522  ;;  %2222 = vmatpush3.bf16.msra.mxu0 %v2219_v19 }
 0x4d7   :  { %2202 = vmatprep.subr.bf16.mxu1 %v2201_v24 }
 0x4d8   :  { %v2346_v26 = vpop.eup %2345  ;;  %2204 = vmatpush3.bf16.msra.mxu1 %v2201_v24 }
 0x4d9   :  { %v2348_v27 = vpop.eup %2347  ;;  %2207 = vmatprep.subr.msk.bf16.mxu1 %vm2513_vm5, %v2205_v25  ;;  %v432_v29 = vmul.f32 %v2346_v26, %v2342_v12  ;;  %v1862_v26 = vld [vmem:[#allocation2 + $0x162] ss:$0 sm:$0xff] }
 0x4da   :  { %v431_v28 = vmul.f32 %v2348_v27, %v2344_v13  ;;  %v2227_v13 = vpack.c.bf16 %v870_v9, %v869_v8 }
 0x4dc   :  { %2044 = vmatprep.mubr.msk.f32.mxu1 %vm323_vm4, %v431_v28 }
 0x4dd   :  { %2045 = vmatmul.mubr.msk.f32.vlgmr.msra.gmra.mrb[4].mxu1 %vm323_vm4, %v432_v29 }
 0x4de   :  { %2051 = vmatprep.mubr.msk.f32.mxu1 %vm323_vm4, %v521_v30 }
 0x4e1   :  { %2210 = vmatpush3.bf16.xpose.msk.msra.mxu1 %vm2513_vm5, %v2205_v25 }
 0x4e8   :  { %2052 = vmatmul.mubr.msk.f32.vlgmr.msra.gmra.mrb[6].mxu1 %vm323_vm4, %v523_v31 }
 0x5b0   :  { %v2544_v32 = vpop.f32.mrb[4].mxu1 }
 0x5b1   :  { %v2546_v35 = vpop.f32.mrb[5].mxu1 }
 0x5bb   :  { %v2053_v36 = vpop.f32.mrb[6].mxu1 }
 0x5bc   :  { %v612_v37 = vmul.f32 0.25, %v2053_v36  ;;  %v602_v38 = vpop.f32.mrb[7].mxu1 }
 0x5bd   :  { %v611_v39 = vmul.f32 0.25, %v602_v38 }
 0x5be   :  { %v614_v40 = vadd.f32 %v612_v37, %v2522_v61 }
 0x5bf   :  { %v613_v42 = vadd.f32 %v611_v39, %v2524_v0 }
 0x5c0   :  { %v618_v43 = vsel %vm323_vm4, %v614_v40, -inf }
 0x5c1   :  { %619 = vmax.xlane.f32.xlu0 %v618_v43  ;;  %v615_v45 = vsel %vm323_vm4, %v613_v42, -inf }
 0x5c2   :  { %616 = vmax.xlane.f32.xlu1 %v615_v45 }
 0x64e   :  { %v620_v49 = vpop.xlane.xlu0 %619 }
 0x64f   :  { %v622_v50 = vsub.f32 %v614_v40, %v620_v49  ;;  %v617_v51 = vpop.xlane.xlu1 %616 }
 0x650   :  { %v621_v53 = vsub.f32 %v613_v42, %v617_v51 }
 0x651   :  { %v625_v54 = vmul.f32 1.442695, %v622_v50 }
 0x652   :  { %v623_v55 = vmul.f32 1.442695, %v621_v53 }
 0x653   :  { %2349 = vpow2.f32 %v625_v54 }
 0x654   :  { %2351 = vpow2.f32 %v623_v55 }
 0x65d   :  { %v2350_v56 = vpop.eup %2349 }
 0x65e   :  { %v2352_v57 = vpop.eup %2351  ;;  %v630_v58 = vsel %vm323_vm4, %v2350_v56, 0.0 }
 0x65f   :  { %631 = vadd.xlane.f32.xlu1 %v630_v58  ;;  %v627_v59 = vsel %vm323_vm4, %v2352_v57, 0.0 }
 0x660   :  { %628 = vadd.xlane.f32.xlu0 %v627_v59 }
 0x676   :  { %2322 = vrot.lane.b32.xlu0 %v2498_v41, %s2443_s29 }
 0x6ec   :  { %v632_v60 = vpop.xlane.xlu1 %631 }
 0x6ed   :  { %2353 = vrcp.f32 %v632_v60  ;;  %v629_v62 = vpop.xlane.xlu0 %628 }
 0x6ee   :  { %2355 = vrcp.f32 %v629_v62  ;;  %v1865_v62 = vld [vmem:[#allocation2 + $0x168] ss:$0 sm:$0xff] }
 0x6f1   :  { %v2323_v63 = vpop.permute.xlu0 %2322 }
 0x6f2   :  { %v2325_v3 = vunpack.i.h.bf16 %v2323_v63  ;;  %v2324_v4 = vunpack.i.l.bf16 %v2323_v63 }
 0x6f4   :  { %v2211_v5 = vpack.c.bf16 %v2325_v3, %v2324_v4 }
 0x6f6   :  { %2212 = vmatprep.subr.bf16.mxu1 %v2211_v5 }
 0x6f7   :  { %v2354_v7 = vpop.eup %2353  ;;  %2214 = vmatpush3.bf16.msra.mxu1 %v2211_v5 }
 0x6f8   :  { %v2356_v10 = vpop.eup %2355  ;;  %2224 = vmatprep.subr.bf16.mxu1 %v2223_v6  ;;  %v636_v12 = vmul.f32 %v2354_v7, %v2350_v56 }
 0x6f9   :  { %v635_v11 = vmul.f32 %v2356_v10, %v2352_v57 }
 0x6fb   :  { %2058 = vmatprep.mubr.msk.f32.mxu1 %vm323_vm4, %v635_v11 }
 0x6fc   :  { %2059 = vmatmul.mubr.msk.f32.vlgmr.msra.gmra.mrb[8].mxu1 %vm323_vm4, %v636_v12  ;;  %v1867_v12 = vld [vmem:[#allocation2 + $0x163] ss:$0 sm:$0xff] }
 0x6fd   :  { %2226 = vmatpush3.bf16.msra.mxu1 %v2223_v6 }
 0x6fe   :  { %2228 = vmatprep.subr.bf16.mxu1 %v2227_v13 }
 0x701   :  { %2230 = vmatpush3.bf16.msra.mxu1 %v2227_v13 }
 0x702   :  { %2238 = vmatprep.subr.bf16.mxu1 %v2509_v48 }
 0x7cf   :  { %v2060_v20 = vpop.f32.mrb[8].mxu1 }
 0x7d0   :  { %v715_v21 = vpop.f32.mrb[9].mxu1 }
 0x7d1   :  { %726 = vrot.lane.b32.xlu1 %v715_v21, %s2444_s30 }
 0x7d5   :  { %728 = vrot.lane.b32.xlu1 %v2060_v20, %s2444_s30 }
 0x843   :  { %v727_v22 = vpop.permute.xlu1 %726 }
 0x844   :  { %v732_v23 = vsel %vm323_vm4, %v2546_v35, %v727_v22 }
 0x845   :  { %2069 = vmatprep.mubr.msk.f32.mxu0 %vm151_vm3, %v732_v23 }
 0x847   :  { %v729_v24 = vpop.permute.xlu1 %728 }
 0x848   :  { %v733_v25 = vsel %vm323_vm4, %v2544_v32, %v729_v24 }
 0x849   :  { %2070 = vmatmul.mubr.msk.f32.vlgmr.msra.gmra.mrb[4].mxu0 %vm151_vm3, %v733_v25 }
 0x91c   :  { %v2071_v27 = vpop.f32.mrb[4].mxu0 }
 0x91d   :  { %v821_v28 = vadd.f32 %v2071_v27, %v1862_v26  ;;  %v815_v29 = vpop.f32.mrb[5].mxu0 }
 0x91e   :  { %v816_v30 = vadd.f32 %v1862_v26, %v815_v29 }
 0x91f   :  { %v825_v31 = vadd.f32 %v2485_v33, %v821_v28 }
 0x920   :  { %v824_v36 = vadd.f32 %v816_v30, %v2487_v34 }
 0x921   :  { %v831_v37 = vsel %vm151_vm3, %v825_v31, 0.0 }
 0x922   :  { %832 = vadd.xlane.f32.xlu1 %v831_v37  ;;  %v828_v35 = vsel %vm151_vm3, %v824_v36, 0.0 }
 0x923   :  { %829 = vadd.xlane.f32.xlu0 %v828_v35 }
 0x933   :  { %2327 = vrot.lane.b32.xlu1 %v2498_v41, %s2445_s3 }
 0x937   :  { %2332 = vrot.lane.b32.xlu1 %v2498_v41, %s2444_s30 }
 0x9af   :  { %v833_v32 = vpop.xlane.xlu1 %832 }
 0x9b0   :  { %v836_v38 = vmul.f32 0.03125, %v833_v32  ;;  %v830_v39 = vpop.xlane.xlu0 %829 }
 0x9b1   :  { %v835_v40 = vmul.f32 0.03125, %v830_v39 }
 0x9b2   :  { %v838_v42 = vsub.f32 %v825_v31, %v836_v38 }
 0x9b3   :  { %v837_v33 = vsub.f32 %v824_v36, %v835_v40  ;;  %v2328_v43 = vpop.permute.xlu1 %2327 }
 0x9b4   :  { %v2330_v34 = vunpack.i.h.bf16 %v2328_v43  ;;  %v2329_v45 = vunpack.i.l.bf16 %v2328_v43  ;;  %v840_v53 = vmul.f32 %v838_v42, %v838_v42 }
 0x9b5   :  { %v839_v49 = vmul.f32 %v837_v33, %v837_v33 }
 0x9b6   :  { %v2231_v50 = vpack.c.bf16 %v2330_v34, %v2329_v45  ;;  %v844_v41 = vsel %vm151_vm3, %v840_v53, 0.0 }
 0x9b7   :  { %v841_v51 = vsel %vm151_vm3, %v839_v49, 0.0  ;;  %v2333_v4 = vpop.permute.xlu1 %2332 }
 0x9b8   :  { %2233 = vmatprep.subr.msk.bf16.mxu0 %vm2513_vm5, %v2231_v50  ;;  %842 = vadd.xlane.f32.xlu0 %v841_v51  ;;  %v2335_v7 = vunpack.i.h.bf16 %v2333_v4  ;;  %v2334_v8 = vunpack.i.l.bf16 %v2333_v4 }
 0x9b9   :  { %2236 = vmatpush3.bf16.xpose.msk.msra.mxu0 %vm2513_vm5, %v2231_v50 }
 0x9ba   :  { %v2241_v11 = vpack.c.bf16 %v2335_v7, %v2334_v8 }
 0x9bc   :  { %845 = vadd.xlane.f32.xlu0 %v844_v41 }
 0xa45   :  { %v843_v54 = vpop.xlane.xlu0 %842 }
 0xa46   :  { %v847_v55 = vmul.f32 0.03125, %v843_v54 }
 0xa48   :  { %v849_v56 = vadd.f32 1e-05, %v847_v55 }
 0xa49   :  { %v846_v57 = vpop.xlane.xlu0 %845 }
 0xa4a   :  { %2357 = vrsqrt.f32 %v849_v56  ;;  %v848_v58 = vmul.f32 0.03125, %v846_v57 }
 0xa4c   :  { %v850_v59 = vadd.f32 1e-05, %v848_v58 }
 0xa4e   :  { %2359 = vrsqrt.f32 %v850_v59 }
 0xa54   :  { %v2358_v60 = vpop.eup %2357 }
 0xa55   :  { %v853_v63 = vmul.f32 %v2358_v60, %v837_v33 }
 0xa57   :  { %v859_v2 = vmul.f32 %v1865_v62, %v853_v63 }
 0xa58   :  { %v2360_v3 = vpop.eup %2359 }
 0xa59   :  { %v854_v5 = vmul.f32 %v2360_v3, %v838_v42  ;;  %v2579_v6 = vadd.f32 %v1866_v1, %v859_v2 }
 0xa5b   :  { %v860_v9 = vmul.f32 %v1865_v62, %v854_v5  ;;  %2080 = vmatprep.mubr.msk.f32.mxu1 %vm151_vm3, %v2579_v6 }
 0xa5d   :  { %v2583_v10 = vadd.f32 %v1866_v1, %v860_v9 }
 0xa5f   :  { %2081 = vmatmul.mubr.msk.f32.vlgmr.msra.gmra.mrb[10].mxu1 %vm151_vm3, %v2583_v10 }
 0xa60   :  { %2240 = vmatpush3.bf16.msra.mxu1 %v2509_v48 }
 0xa61   :  { %2243 = vmatprep.subr.msk.bf16.mxu1 %vm2513_vm5, %v2241_v11 }
 0xb32   :  { %v2082_v13 = vpop.f32.mrb[10].mxu1 }
 0xb33   :  { %v954_v14 = vadd.f32 %v2082_v13, %v1867_v12  ;;  %v948_v15 = vpop.f32.mrb[11].mxu1 }
 0xb34   :  { %v949_v16 = vadd.f32 %v1867_v12, %v948_v15  ;;  %v1372_v15 = vld [vmem:[#allocation2 + $0xd8] sm:$0xff] }
 0xb35   :  { %1155 = vrot.lane.b32.xlu1 %v954_v14, %s2441_s27 }
 0xb36   :  { %2087 = vmatprep.mubr.msk.f32.mxu0 %vm323_vm4, %v949_v16 }
 0xb37   :  { %2088 = vmatmul.mubr.msk.f32.vlgmr.msra.gmra.mrb[6].mxu0 %vm323_vm4, %v954_v14  ;;  %v2251_v14 = vpack.c.bf16 %v1370_v46, %v1369_v44  ;;  %v1887_v46 = vld [vmem:[#allocation2 + $0x165] ss:$0 sm:$0xff] }
 0xba7   :  { %v1156_v43 = vpop.permute.xlu1 %1155 }
 0xc0a   :  { %v2089_v17 = vpop.f32.mrb[6].mxu0 }
 0xc0b   :  { %v1037_v18 = vpop.f32.mrb[7].mxu0  ;;  %v1047_v19 = vmul.f32 0.25, %v2089_v17 }
 0xc0c   :  { %v1046_v20 = vmul.f32 0.25, %v1037_v18 }
 0xc0d   :  { %v1049_v22 = vadd.f32 %v1047_v19, %v2522_v61 }
 0xc0e   :  { %v1048_v48 = vadd.f32 %v1046_v20, %v2524_v0 }
 0xc0f   :  { %v1053_v23 = vsel %vm323_vm4, %v1049_v22, -inf }
 0xc10   :  { %v1050_v21 = vsel %vm323_vm4, %v1048_v48, -inf }
 0xc11   :  { %1051 = vmax.xlane.f32.xlu0 %v1050_v21 }
 0xc15   :  { %1054 = vmax.xlane.f32.xlu0 %v1053_v23 }
 0xc9e   :  { %v1052_v24 = vpop.xlane.xlu0 %1051 }
 0xc9f   :  { %v1056_v25 = vsub.f32 %v1048_v48, %v1052_v24 }
 0xca1   :  { %v1058_v26 = vmul.f32 1.442695, %v1056_v25 }
 0xca2   :  { %v1055_v27 = vpop.xlane.xlu0 %1054 }
 0xca3   :  { %2361 = vpow2.f32 %v1058_v26  ;;  %v1057_v28 = vsub.f32 %v1049_v22, %v1055_v27  ;;  %v1882_v22 = vld [vmem:[#allocation2 + $0x164] ss:$0 sm:$0xff] }
 0xca5   :  { %v1060_v29 = vmul.f32 1.442695, %v1057_v28 }
 0xca7   :  { %2363 = vpow2.f32 %v1060_v29 }
 0xcad   :  { %v2362_v30 = vpop.eup %2361 }
 0xcae   :  { %v1062_v31 = vsel %vm323_vm4, %v2362_v30, 0.0 }
 0xcaf   :  { %1063 = vadd.xlane.f32.xlu0 %v1062_v31 }
 0xcb1   :  { %v2364_v36 = vpop.eup %2363 }
 0xcb2   :  { %v1065_v37 = vsel %vm323_vm4, %v2364_v36, 0.0 }
 0xcb3   :  { %1066 = vadd.xlane.f32.xlu0 %v1065_v37 }
 0xcc9   :  { %1153 = vrot.lane.b32.xlu0 %v949_v16, %s2441_s27 }
 0xd3c   :  { %v1064_v35 = vpop.xlane.xlu0 %1063 }
 0xd3d   :  { %2365 = vrcp.f32 %v1064_v35 }
 0xd40   :  { %v1067_v32 = vpop.xlane.xlu0 %1066 }
 0xd41   :  { %2367 = vrcp.f32 %v1067_v32 }
 0xd44   :  { %v1154_v33 = vpop.permute.xlu0 %1153 }
 0xd47   :  { %v2366_v38 = vpop.eup %2365 }
 0xd48   :  { %v1070_v39 = vmul.f32 %v2366_v38, %v2362_v30 }
 0xd4a   :  { %2094 = vmatprep.mubr.msk.f32.mxu1 %vm323_vm4, %v1070_v39 }
 0xd4b   :  { %v2368_v40 = vpop.eup %2367 }
 0xd4c   :  { %v1071_v42 = vmul.f32 %v2368_v40, %v2364_v36 }
 0xd4e   :  { %2095 = vmatmul.mubr.msk.f32.vlgmr.msra.gmra.mrb[12].mxu1 %vm323_vm4, %v1071_v42 }
 0xd4f   :  { %2246 = vmatpush3.bf16.xpose.msk.msra.mxu1 %vm2513_vm5, %v2241_v11  ;;  %2101 = vmatprep.mubr.msk.f32.mxu1 %vm323_vm4, %v1154_v33  ;;  %v1502_v33 = vld [vmem:[#allocation2 + $0xe8] sm:$0xff] }
 0xd56   :  { %2102 = vmatmul.mubr.msk.f32.vlgmr.msra.gmra.mrb[14].mxu1 %vm323_vm4, %v1156_v43 }
 0xe21   :  { %v2096_v34 = vpop.f32.mrb[12].mxu1 }
 0xe22   :  { %v1144_v45 = vpop.f32.mrb[13].mxu1 }
 0xe29   :  { %v2103_v49 = vpop.f32.mrb[14].mxu1 }
 0xe2a   :  { %v1245_v50 = vmul.f32 0.25, %v2103_v49  ;;  %v1235_v51 = vpop.f32.mrb[15].mxu1 }
 0xe2b   :  { %v1244_v53 = vmul.f32 0.25, %v1235_v51  ;;  %v1594_v51 = vld [vmem:[#allocation2 + $0x108] sm:$0xff] }
 0xe2c   :  { %v1247_v41 = vadd.f32 %v1245_v50, %v2522_v61  ;;  %v1593_v50 = vld [vmem:[#allocation2 + $0x100] sm:$0xff] }
 0xe2d   :  { %v1246_v54 = vadd.f32 %v1244_v53, %v2524_v0  ;;  %v1595_v53 = vld [vmem:[#allocation2 + $0x110] sm:$0xff] }
 0xe2e   :  { %v1251_v55 = vsel %vm323_vm4, %v1247_v41, -inf }
 0xe2f   :  { %1252 = vmax.xlane.f32.xlu0 %v1251_v55  ;;  %v1248_v52 = vsel %vm323_vm4, %v1246_v54, -inf }
 0xe30   :  { %1249 = vmax.xlane.f32.xlu1 %v1248_v52  ;;  %v1597_v52 = vld [vmem:[#allocation2 + $0x120] sm:$0xff] }
 0xebc   :  { %v1253_v56 = vpop.xlane.xlu0 %1252 }
 0xebd   :  { %v1255_v57 = vsub.f32 %v1247_v41, %v1253_v56  ;;  %v1250_v58 = vpop.xlane.xlu1 %1249  ;;  %v2267_v41 = vpack.c.bf16 %v1594_v51, %v1593_v50  ;;  %v1598_v56 = vld [vmem:[#allocation2 + $0x128] sm:$0xff] }
 0xebe   :  { %v1254_v59 = vsub.f32 %v1246_v54, %v1250_v58  ;;  %v1596_v54 = vld [vmem:[#allocation2 + $0x118] sm:$0xff] }
 0xebf   :  { %v1258_v60 = vmul.f32 1.442695, %v1255_v57  ;;  %v2271_v55 = vpack.c.bf16 %v1596_v54, %v1595_v53  ;;  %v2275_v57 = vpack.c.bf16 %v1598_v56, %v1597_v52  ;;  %v1894_v56 = vld [vmem:[#allocation2 + $0x16d] ss:$0 sm:$0xff] }
 0xec0   :  { %v1256_v62 = vmul.f32 1.442695, %v1254_v59 }
 0xec1   :  { %2369 = vpow2.f32 %v1258_v60 }
 0xec2   :  { %2371 = vpow2.f32 %v1256_v62 }
 0xecb   :  { %v2370_v63 = vpop.eup %2369 }
 0xecc   :  { %v1263_v1 = vsel %vm323_vm4, %v2370_v63, 0.0  ;;  %v2372_v61 = vpop.eup %2371 }
 0xecd   :  { %1264 = vadd.xlane.f32.xlu1 %v1263_v1  ;;  %v1260_v0 = vsel %vm323_vm4, %v2372_v61, 0.0 }
 0xed1   :  { %1261 = vadd.xlane.f32.xlu1 %v1260_v0  ;;  %v1885_v0 = vld [vmem:[#allocation2 + $0x16a] ss:$0 sm:$0xff] }
 0xee2   :  { %2337 = vrot.lane.b32.xlu1 %v2336_v47, %s2441_s27  ;;  %v1371_v47 = vld [vmem:[#allocation2 + $0xd0] sm:$0xff] }
 0xee3   :  { %v2255_v16 = vpack.c.bf16 %v1372_v15, %v1371_v47 }
 0xf5a   :  { %v1265_v2 = vpop.xlane.xlu1 %1264 }
 0xf5b   :  { %2373 = vrcp.f32 %v1265_v2 }
 0xf5e   :  { %v1262_v3 = vpop.xlane.xlu1 %1261 }
 0xf5f   :  { %2375 = vrcp.f32 %v1262_v3 }
 0xf62   :  { %v2338_v4 = vpop.permute.xlu1 %2337 }
 0xf63   :  { %v2340_v5 = vunpack.i.h.bf16 %v2338_v4  ;;  %v2339_v7 = vunpack.i.l.bf16 %v2338_v4 }
 0xf65   :  { %v2247_v8 = vpack.c.bf16 %v2340_v5, %v2339_v7  ;;  %v2374_v9 = vpop.eup %2373  ;;  %v1886_v5 = vld [vmem:[#allocation2 + $0x16b] ss:$0 sm:$0xff] }
 0xf66   :  { %v1269_v13 = vmul.f32 %v2374_v9, %v2370_v63 }
 0xf67   :  { %2248 = vmatprep.subr.bf16.mxu0 %v2247_v8 }
 0xf68   :  { %2250 = vmatpush3.bf16.msra.mxu0 %v2247_v8 }
 0xf69   :  { %v2376_v11 = vpop.eup %2375  ;;  %2252 = vmatprep.subr.bf16.mxu0 %v2251_v14 }
 0xf6a   :  { %v1268_v12 = vmul.f32 %v2376_v11, %v2372_v61 }
 0xf6c   :  { %2108 = vmatprep.mubr.msk.f32.mxu0 %vm323_vm4, %v1268_v12  ;;  %v1599_v12 = vld [vmem:[#allocation2 + $0x130] sm:$0xff] }
 0xf6d   :  { %2109 = vmatmul.mubr.msk.f32.vlgmr.msra.gmra.mrb[8].mxu0 %vm323_vm4, %v1269_v13  ;;  %v1600_v13 = vld [vmem:[#allocation2 + $0x138] sm:$0xff] }
 0xf6e   :  { %2254 = vmatpush3.bf16.msra.mxu0 %v2251_v14  ;;  %v2279_v44 = vpack.c.bf16 %v1600_v13, %v1599_v12 }
 0xf6f   :  { %2256 = vmatprep.subr.bf16.mxu0 %v2255_v16 }
 0xf72   :  { %2258 = vmatpush3.bf16.msra.mxu0 %v2255_v16 }
 0xf73   :  { %2268 = vmatprep.subr.bf16.mxu0 %v2267_v41 }
0x1040   :  { %v2110_v17 = vpop.f32.mrb[8].mxu0 }
0x1041   :  { %1363 = vrot.lane.b32.xlu1 %v2110_v17, %s2444_s30  ;;  %v1350_v18 = vpop.f32.mrb[9].mxu0 }
0x1042   :  { %1361 = vrot.lane.b32.xlu0 %v1350_v18, %s2444_s30 }
0x10b3   :  { %v1364_v19 = vpop.permute.xlu1 %1363 }
0x10b4   :  { %v1362_v20 = vpop.permute.xlu0 %1361  ;;  %v1368_v21 = vsel %vm323_vm4, %v2096_v34, %v1364_v19  ;;  %v1503_v34 = vld [vmem:[#allocation2 + $0xf0] sm:$0xff] }
0x10b5   :  { %v1367_v48 = vsel %vm323_vm4, %v1144_v45, %v1362_v20  ;;  %v1504_v45 = vld [vmem:[#allocation2 + $0xf8] sm:$0xff]  ;;  %v1892_v20 = vld [vmem:[#allocation2 + $0x166] ss:$0 sm:$0xff] }
0x10b6   :  { %2119 = vmatprep.mubr.msk.f32.mxu0 %vm151_vm3, %v1367_v48  ;;  %v2263_v49 = vpack.c.bf16 %v1504_v45, %v1503_v34 }
0x10b7   :  { %2120 = vmatmul.mubr.msk.f32.vlgmr.msra.gmra.mrb[10].mxu0 %vm151_vm3, %v1368_v21 }
0x10b8   :  { %2270 = vmatpush3.bf16.msra.mxu0 %v2267_v41  ;;  %v1893_v41 = vld [vmem:[#allocation2 + $0x16c] ss:$0 sm:$0xff] }
0x10b9   :  { %2272 = vmatprep.subr.bf16.mxu0 %v2271_v55 }
0x10bc   :  { %2274 = vmatpush3.bf16.msra.mxu0 %v2271_v55 }
0x10bd   :  { %2276 = vmatprep.subr.bf16.mxu0 %v2275_v57 }
0x10c0   :  { %2278 = vmatpush3.bf16.msra.mxu0 %v2275_v57 }
0x10c1   :  { %2280 = vmatprep.subr.bf16.mxu0 %v2279_v44 }
0x10c4   :  { %2282 = vmatpush3.bf16.msra.mxu0 %v2279_v44 }
0x118a   :  { %v2121_v23 = vpop.f32.mrb[10].mxu0 }
0x118b   :  { %v1456_v24 = vadd.f32 %v2121_v23, %v1882_v22  ;;  %v1450_v25 = vpop.f32.mrb[11].mxu0 }
0x118c   :  { %v1451_v26 = vadd.f32 %v1882_v22, %v1450_v25 }
0x118d   :  { %v1460_v27 = vadd.f32 %v1456_v24, %v2583_v10 }
0x118e   :  { %v1459_v28 = vadd.f32 %v1451_v26, %v2579_v6  ;;  %v1501_v6 = vld [vmem:[#allocation2 + $0xe0] sm:$0xff] }
0x118f   :  { %v1466_v29 = vsel %vm151_vm3, %v1460_v27, 0.0  ;;  %v2259_v43 = vpack.c.bf16 %v1502_v33, %v1501_v6  ;;  %v1734_v6 = vld [vmem:[#allocation2 + $0x158] sm:$0xff] }
0x1190   :  { %1467 = vadd.xlane.f32.xlu0 %v1466_v29  ;;  %v1463_v30 = vsel %vm151_vm3, %v1459_v28, 0.0 }
0x1191   :  { %1464 = vadd.xlane.f32.xlu1 %v1463_v30  ;;  %2260 = vmatprep.subr.bf16.mxu1 %v2259_v43 }
0x1192   :  { %2262 = vmatpush3.bf16.msra.mxu1 %v2259_v43 }
0x1193   :  { %2264 = vmatprep.subr.bf16.mxu1 %v2263_v49 }
0x1196   :  { %2266 = vmatpush3.bf16.msra.mxu1 %v2263_v49 }
0x121d   :  { %v1468_v31 = vpop.xlane.xlu0 %1467 }
0x121e   :  { %v1470_v36 = vmul.f32 0.03125, %v1468_v31  ;;  %v1465_v37 = vpop.xlane.xlu1 %1464 }
0x121f   :  { %v1469_v35 = vmul.f32 0.03125, %v1465_v37 }
0x1220   :  { %v1472_v32 = vsub.f32 %v1460_v27, %v1470_v36 }
0x1221   :  { %v1471_v38 = vsub.f32 %v1459_v28, %v1469_v35 }
0x1222   :  { %v1474_v39 = vmul.f32 %v1472_v32, %v1472_v32 }
0x1223   :  { %v1473_v40 = vmul.f32 %v1471_v38, %v1471_v38 }
0x1224   :  { %v1478_v42 = vsel %vm151_vm3, %v1474_v39, 0.0  ;;  %v1731_v39 = vld [vmem:[#allocation2 + $0x140] sm:$0xff] }
0x1225   :  { %1479 = vadd.xlane.f32.xlu1 %v1478_v42  ;;  %v1475_v10 = vsel %vm151_vm3, %v1473_v40, 0.0  ;;  %v1732_v40 = vld [vmem:[#allocation2 + $0x148] sm:$0xff] }
0x1226   :  { %1476 = vadd.xlane.f32.xlu0 %v1475_v10  ;;  %v2283_v42 = vpack.c.bf16 %v1732_v40, %v1731_v39  ;;  %v1733_v10 = vld [vmem:[#allocation2 + $0x150] sm:$0xff] }
0x1227   :  { %v2287_v33 = vpack.c.bf16 %v1734_v6, %v1733_v10 }
0x1228   :  { %2284 = vmatprep.subr.bf16.mxu1 %v2283_v42 }
0x12b2   :  { %v1480_v58 = vpop.xlane.xlu1 %1479 }
0x12b3   :  { %v1482_v59 = vmul.f32 0.03125, %v1480_v58  ;;  %v1477_v60 = vpop.xlane.xlu0 %1476 }
0x12b4   :  { %v1481_v62 = vmul.f32 0.03125, %v1477_v60 }
0x12b5   :  { %v1484_v63 = vadd.f32 1e-05, %v1482_v59 }
0x12b6   :  { %v1483_v1 = vadd.f32 1e-05, %v1481_v62  ;;  %v1895_v62 = vld [vmem:[#allocation2 + $0x167] ss:$0 sm:$0xff] }
0x12b7   :  { %2377 = vrsqrt.f32 %v1484_v63 }
0x12b8   :  { %2379 = vrsqrt.f32 %v1483_v1 }
0x12c1   :  { %v2378_v61 = vpop.eup %2377 }
0x12c2   :  { %v2380_v2 = vpop.eup %2379  ;;  %v1488_v3 = vmul.f32 %v2378_v61, %v1472_v32 }
0x12c3   :  { %v1487_v4 = vmul.f32 %v2380_v2, %v1471_v38 }
0x12c4   :  { %v1494_v7 = vmul.f32 %v1885_v0, %v1488_v3 }
0x12c5   :  { %v1493_v8 = vmul.f32 %v1885_v0, %v1487_v4 }
0x12c6   :  { %v1500_v11 = vadd.f32 %v1886_v5, %v1494_v7 }
0x12c7   :  { %v1499_v9 = vadd.f32 %v1886_v5, %v1493_v8 }
0x12c9   :  { %2130 = vmatprep.mubr.msk.f32.mxu1 %vm151_vm3, %v1499_v9 }
0x12ca   :  { %2131 = vmatmul.mubr.msk.f32.vlgmr.msra.gmra.mrb[16].mxu1 %vm151_vm3, %v1500_v11 }
0x12cb   :  { %2286 = vmatpush3.bf16.msra.mxu1 %v2283_v42 }
0x12cc   :  { %2288 = vmatprep.subr.bf16.mxu1 %v2287_v33 }
0x12cf   :  { %2290 = vmatpush3.bf16.msra.mxu1 %v2287_v33 }
0x139d   :  { %v2132_v47 = vpop.f32.mrb[16].mxu1 }
0x139e   :  { %v1588_v14 = vadd.f32 %v2132_v47, %v1887_v46  ;;  %v1582_v15 = vpop.f32.mrb[17].mxu1 }
0x139f   :  { %v1583_v16 = vadd.f32 %v1887_v46, %v1582_v15 }
0x13a0   :  { %v1592_v18 = vmax.f32 %v1588_v14, 0.0 }
0x13a1   :  { %v1591_v17 = vmax.f32 %v1583_v16, 0.0 }
0x13a3   :  { %2149 = vmatprep.mubr.msk.f32.mxu0 %vm50_vm0, %v1591_v17 }
0x13a4   :  { %2150 = vmatmul.mubr.msk.f32.vlgmr.msra.gmra.mrb[12].mxu0 %vm50_vm0, %v1592_v18 }
0x1477   :  { %v2151_v19 = vpop.f32.mrb[12].mxu0 }
0x1478   :  { %v1683_v48 = vadd.f32 %v2151_v19, %v1500_v11  ;;  %v1673_v21 = vpop.f32.mrb[13].mxu0 }
0x1479   :  { %v1682_v22 = vadd.f32 %v1673_v21, %v1499_v9 }
0x147a   :  { %v1690_v23 = vadd.f32 %v1892_v20, %v1683_v48 }
0x147b   :  { %v1689_v24 = vadd.f32 %v1892_v20, %v1682_v22 }
0x147c   :  { %v1696_v25 = vsel %vm151_vm3, %v1690_v23, 0.0 }
0x147d   :  { %1697 = vadd.xlane.f32.xlu1 %v1696_v25  ;;  %v1693_v26 = vsel %vm151_vm3, %v1689_v24, 0.0 }
0x147e   :  { %1694 = vadd.xlane.f32.xlu0 %v1693_v26 }
0x150a   :  { %v1698_v27 = vpop.xlane.xlu1 %1697 }
0x150b   :  { %v1700_v28 = vmul.f32 0.03125, %v1698_v27  ;;  %v1695_v29 = vpop.xlane.xlu0 %1694 }
0x150c   :  { %v1699_v30 = vmul.f32 0.03125, %v1695_v29 }
0x150d   :  { %v1702_v31 = vsub.f32 %v1690_v23, %v1700_v28 }
0x150e   :  { %v1701_v36 = vsub.f32 %v1689_v24, %v1699_v30 }
0x150f   :  { %v1704_v37 = vmul.f32 %v1702_v31, %v1702_v31 }
0x1510   :  { %v1703_v35 = vmul.f32 %v1701_v36, %v1701_v36 }
0x1511   :  { %v1708_v32 = vsel %vm151_vm3, %v1704_v37, 0.0 }
0x1512   :  { %1709 = vadd.xlane.f32.xlu1 %v1708_v32  ;;  %v1705_v38 = vsel %vm151_vm3, %v1703_v35, 0.0 }
0x1513   :  { %1706 = vadd.xlane.f32.xlu0 %v1705_v38 }
0x159f   :  { %v1710_v43 = vpop.xlane.xlu1 %1709 }
0x15a0   :  { %v1712_v34 = vmul.f32 0.03125, %v1710_v43  ;;  %v1707_v45 = vpop.xlane.xlu0 %1706 }
0x15a1   :  { %v1711_v49 = vmul.f32 0.03125, %v1707_v45 }
0x15a2   :  { %v1714_v50 = vadd.f32 1e-05, %v1712_v34 }
0x15a3   :  { %v1713_v51 = vadd.f32 1e-05, %v1711_v49 }
0x15a4   :  { %2381 = vrsqrt.f32 %v1714_v50 }
0x15a5   :  { %2383 = vrsqrt.f32 %v1713_v51 }
0x15ae   :  { %v2382_v53 = vpop.eup %2381 }
0x15af   :  { %v2384_v54 = vpop.eup %2383  ;;  %v1718_v55 = vmul.f32 %v2382_v53, %v1702_v31 }
0x15b0   :  { %v1717_v52 = vmul.f32 %v2384_v54, %v1701_v36 }
0x15b1   :  { %v1724_v57 = vmul.f32 %v1893_v41, %v1718_v55 }
0x15b2   :  { %v1723_v58 = vmul.f32 %v1893_v41, %v1717_v52 }
0x15b3   :  { %v1730_v60 = vadd.f32 %v1894_v56, %v1724_v57 }
0x15b4   :  { %v1729_v59 = vadd.f32 %v1894_v56, %v1723_v58 }
0x15b6   :  { %2160 = vmatprep.mubr.msk.f32.mxu1 %vm151_vm3, %v1729_v59 }
0x15b7   :  { %2161 = vmatmul.mubr.msk.f32.vlgmr.msra.gmra.mrb[18].mxu1 %vm151_vm3, %v1730_v60 }
0x168a   :  { %v2162_v63 = vpop.f32.mrb[18].mxu1 }
0x168b   :  { %v1818_v1 = vadd.f32 %v2162_v63, %v1895_v62  ;;  %v1812_v61 = vpop.f32.mrb[19].mxu1 }
0x168c   :  { %v1813_v0 = vadd.f32 %v1895_v62, %v1812_v61 }
0x168d   :  { %1822 = vst [vmem:[#allocation5 + $0x8] sm:$0xff] %v1818_v1 }
0x168e   :  { %1821 = vst [vmem:[#allocation5] sm:$0xff] %v1813_v0 }
0x168f   :  { %2418 = shalt.err (!%p2415_p12)
}
0x1690   :  { %s2419_s9 = scalar_lea.hbm %s2657_s2, 256 }
0x1691   :  { %p2420_p13 = scmp.ne.s32.totalorder %s2657_s2, %s2419_s9  ;;  %p2423_p0 = scmp.lt.u32.totalorder %s2419_s9, %s2657_s2 }
0x1693   :  { %p2425_p1 = pnand %p2423_p0, %p2420_p13 }
0x1695   :  { %2428 = shalt.err (!%p2425_p1)
}
0x1696   :  { %1834 = dma.vmem_to_hbm [thread:$0]  %s1829_s5, 256, %s2657_s2, [#allocation4], %s2434_s19, %s2434_s19, %s2435_s20  }
0x1697   :  { %2431 = dma.done.wait [#allocation4], 256  }
0x1698   :  { %2432 = vsyncadd [#allocation4], 4294967040 }
0x1699   :  { %1838 = vsyncpa [#allocation3], 1 }
0x169a   :  { %1839 = vsyncpa [#allocation4], 1 }

</bundles_post_ra>
